<compile_context>
chip_gen: v7x
topology: tpu7x:2x2x1
jax: 0.10.0
libtpu: 0.0.40
codegen_flags: <defaults>
</compile_context>

<pallas_src>
import numpy as np
import jax
import jax.numpy as jnp
from jax.experimental import pallas as pl
from jax.experimental.pallas import tpu as pltpu


def _sigmoid(v):
    # exp and approximate reciprocal both run on the EUP slot.
    return pl.reciprocal(1.0 + jnp.exp(-v), approx=True)


# ----------------------------------------------------------------------------
# Fused kernel factory
# ----------------------------------------------------------------------------
def _make_kernel(H, W, C, NB, NL):
    P = W + 2
    # flat padded-raster offset of 3x3 conv tap (dh, dw); for interior pixels
    # i + off always stays inside [0, NPAD) so the roll wrap only touches the
    # (masked / discarded) ring and lane-tail positions.
    OFFS = tuple((dh - 1) * P + (dw - 1) for dh in range(3) for dw in range(3))
    SHIFTS = tuple((-off) % NL for off in OFFS)

    def _tap(img, t):
        return img if SHIFTS[t] == 0 else pltpu.roll(img, shift=SHIFTS[t], axis=1)

    def kernel(mask_ref, x_ref, w1_ref, s1_ref, b1_ref, w2_ref, s2_ref,
               b2_ref, wc1_ref, wc2_ref, ws_ref, o_ref, col_ref):
        f32 = jnp.float32
        mask = mask_ref[...]                        # (1, NL): 1.0 on interior
        w1t, w2t = w1_ref[...], w2_ref[...]         # (C, 9C)
        s1, b1 = s1_ref[...], b1_ref[...]           # (C, 1)
        s2, b2 = s2_ref[...], b2_ref[...]
        wc1, wc2t = wc1_ref[...], wc2_ref[...]      # (C, Cr)
        ws = [ws_ref[t] for t in range(9)]          # hoisted SMEM scalar loads

        def conv3x3(img, w):
            # img: (C, NL) with zero ring / lane tail.  Each tap is a lane
            # rotation (XLU); one K = 9*C matmul on the MXU.
            for t in range(9):
                col_ref[t * C:(t + 1) * C, :] = _tap(img, t)
            return jnp.dot(w, col_ref[...], preferred_element_type=f32)

        for b in range(NB):
            xin = x_ref[b]                                          # (C, NL)

            # ---- conv1 + bn1(folded) + ReLU; ring/tail zeroed (conv2 padding)
            o1 = jnp.maximum(conv3x3(xin, w1t) * s1 + b1, 0.0) * mask

            # ---- conv2 + bn2(folded) -------------------------------------
            t2 = conv3x3(o1, w2t) * s2 + b2                         # (C, NL)

            # ---- channel attention: global max -> 1x1 -> ReLU -> 1x1 -> sigmoid
            # tiny 1x1s done on VPU/XLU (no MXU round trips on the dep chain)
            chmax = jnp.max(jnp.where(mask > 0.5, t2, -1e30),
                            axis=1, keepdims=True)                  # (C, 1)
            y1 = jnp.maximum(
                jnp.sum(wc1 * chmax, axis=0, keepdims=True), 0.0)   # (1, Cr)
            gate = _sigmoid(
                jnp.sum(wc2t * y1, axis=1, keepdims=True))          # (C, 1)
            oca = t2 * gate

            # ---- spatial attention: channel max -> 3x3 conv (lane rolls) ----
            spm = jnp.max(oca, axis=0, keepdims=True) * mask        # (1, NL)
            sconv = ws[0] * _tap(spm, 0)
            for t in range(1, 9):
                sconv = sconv + ws[t] * _tap(spm, t)
            res = oca * _sigmoid(sconv)

            # ---- residual + ReLU; ring/tail lanes discarded by wrapper ------
            o_ref[b] = jnp.maximum(res + xin, 0.0)

    return kernel


def _pick_nb(N, cap=4):
    """Images per grid step: amortize step overhead, keep grid even if possible."""
    best = 1
    for d in range(min(cap, N), 0, -1):
        if N % d == 0:
            if (N // d) % 2 == 0:
                return d
            if best == 1:
                best = d
    return best


# ----------------------------------------------------------------------------
# Wrapper
# ----------------------------------------------------------------------------
def basic_block_forward(x, p):
    """x: (N, H, W, C) float32 NHWC.  p: dict of parameters (see init_params)."""
    N, H, W, C = x.shape
    P = W + 2
    NPAD = (H + 2) * P
    NL = ((NPAD + 127) // 128) * 128          # lane-dense raster length
    Cr = p["wc1"].shape[1]
    NB = _pick_nb(N)
    kernel = _make_kernel(H, W, C, NB, NL)

    # One-shot layout plumbing (XLA glue): NHWC -> zero-padded NC(H+2)(W+2)
    # flattened to a lane-dense (C, NL) raster per image.
    xt = jnp.transpose(x, (0, 3, 1, 2))
    xp = jnp.pad(xt, ((0, 0), (0, 0), (1, 1), (1, 1))).reshape(N, C, NPAD)
    xp = jnp.pad(xp, ((0, 0), (0, 0), (0, NL - NPAD)))

    # interior mask over the lane-padded flat raster (tiny constant input)
    m = np.zeros((H + 2, P), np.float32)
    m[1:H + 1, 1:W + 1] = 1.0
    mask = jnp.asarray(np.pad(m.reshape(1, NPAD), ((0, 0), (0, NL - NPAD))))

    w1t = p["w1"].reshape(9 * C, C).T          # (Cout, 9*Cin), taps row-major
    w2t = p["w2"].reshape(9 * C, C).T
    s1 = p["s1"].reshape(C, 1); b1 = p["b1"].reshape(C, 1)
    s2 = p["s2"].reshape(C, 1); b2 = p["b2"].reshape(C, 1)
    wc2t = p["wc2"].T                          # (C, Cr)
    ws9 = p["ws"].reshape(9)

    const = lambda n: (0, 0)
    out = pl.pallas_call(
        kernel,
        out_shape=jax.ShapeDtypeStruct((N, C, NL), jnp.float32),
        grid=(N // NB,),
        in_specs=[
            pl.BlockSpec((1, NL), const),                      # mask
            pl.BlockSpec((NB, C, NL), lambda n: (n, 0, 0)),    # x (padded raster)
            pl.BlockSpec((C, 9 * C), const),                   # w1^T
            pl.BlockSpec((C, 1), const),                       # s1
            pl.BlockSpec((C, 1), const),                       # b1
            pl.BlockSpec((C, 9 * C), const),                   # w2^T
            pl.BlockSpec((C, 1), const),                       # s2
            pl.BlockSpec((C, 1), const),                       # b2
            pl.BlockSpec((C, Cr), const),                      # wc1
            pl.BlockSpec((C, Cr), const),                      # wc2^T
            pl.BlockSpec(memory_space=pltpu.MemorySpace.SMEM),  # ws (9,)
        ],
        out_specs=pl.BlockSpec((NB, C, NL), lambda n: (n, 0, 0)),
        scratch_shapes=[pltpu.VMEM((9 * C, NL), jnp.float32)],  # im2col patches
        compiler_params=pltpu.CompilerParams(
            dimension_semantics=("parallel",)),
    )(mask, xp, w1t, s1, b1, w2t, s2, b2, p["wc1"], wc2t, ws9)

    out = out[:, :, :NPAD].reshape(N, C, H + 2, W + 2)[:, :, 1:H + 1, 1:W + 1]
    return jnp.transpose(out, (0, 2, 3, 1))


# ----------------------------------------------------------------------------
# Pure-JAX reference (for correctness check)
# ----------------------------------------------------------------------------
def _conv_same(x, w):
    return jax.lax.conv_general_dilated(
        x, w, window_strides=(1, 1), padding="SAME",
        dimension_numbers=("NHWC", "HWIO", "NHWC"))


def ref_forward(x, p):
    C = x.shape[-1]
    o = _conv_same(x, p["w1"])
    o = o * p["s1"].reshape(1, 1, 1, C) + p["b1"].reshape(1, 1, 1, C)
    o = jnp.maximum(o, 0.0)
    o = _conv_same(o, p["w2"])
    o = o * p["s2"].reshape(1, 1, 1, C) + p["b2"].reshape(1, 1, 1, C)
    # channel attention (AdaptiveMaxPool2d(1) -> 1x1 -> ReLU -> 1x1 -> sigmoid)
    ch = jnp.max(o, axis=(1, 2), keepdims=True)
    y1 = jnp.maximum(jnp.einsum("nijc,cr->nijr", ch, p["wc1"]), 0.0)
    y2 = jax.nn.sigmoid(jnp.einsum("nijr,rc->nijc", y1, p["wc2"]))
    o = o * y2
    # spatial attention (max over channels -> 3x3 conv -> sigmoid)
    sp = jnp.max(o, axis=-1, keepdims=True)
    sp = _conv_same(sp, p["ws"][:, :, None, None])
    o = o * jax.nn.sigmoid(sp)
    return jnp.maximum(o + x, 0.0)


# ----------------------------------------------------------------------------
# Deterministic parameter init (BasicBlock(inplanes=C, planes=C), reduction=8)
# BatchNorm is folded into per-channel scale/bias (inference mode).
# ----------------------------------------------------------------------------
def init_params(key, C, reduction=8):
    Cr = max(C // reduction, 1)
    ks = jax.random.split(key, 13)
    nrm = lambda k, s, sc: sc * jax.random.normal(k, s, jnp.float32)
    w1 = nrm(ks[0], (3, 3, C, C), 0.1)
    w2 = nrm(ks[1], (3, 3, C, C), 0.1)
    g1, be1 = 1.0 + nrm(ks[2], (C,), 0.1), nrm(ks[3], (C,), 0.1)
    m1 = nrm(ks[4], (C,), 0.1)
    v1 = jax.random.uniform(ks[5], (C,), jnp.float32, 0.5, 1.5)
    g2, be2 = 1.0 + nrm(ks[6], (C,), 0.1), nrm(ks[7], (C,), 0.1)
    m2 = nrm(ks[8], (C,), 0.1)
    v2 = jax.random.uniform(ks[9], (C,), jnp.float32, 0.5, 1.5)
    eps = 1e-5
    s1 = g1 / jnp.sqrt(v1 + eps)
    b1 = be1 - m1 * s1
    s2 = g2 / jnp.sqrt(v2 + eps)
    b2 = be2 - m2 * s2
    return dict(
        w1=w1, s1=s1, b1=b1, w2=w2, s2=s2, b2=b2,
        wc1=nrm(ks[10], (C, Cr), 0.3),
        wc2=nrm(ks[11], (Cr, C), 0.3),
        ws=nrm(ks[12], (3, 3), 0.3),
    )


if __name__ == "__main__":
    N, H, W, C = 2, 16, 16, 16   # inplanes = planes = 16, reduction = 8
    key = jax.random.PRNGKey(0)
    kx, kp = jax.random.split(key)
    x = jax.random.normal(kx, (N, H, W, C), jnp.float32)
    params = init_params(kp, C)

    out = jax.jit(basic_block_forward)(x, params)
    out = jax.block_until_ready(out)

    ref = ref_forward(x, params)
    assert out.shape == (N, H, W, C)
    max_err = float(jnp.max(jnp.abs(out - ref)))
    assert jnp.allclose(out, ref, rtol=2e-2, atol=2e-2), (
        f"mismatch vs reference (max abs err {max_err})")
    print("KERNEL_OK")
</pallas_src>

<mosaic_0001>
module attributes {stable_mosaic.version = 11 : i64} {
  func.func @kernel(%arg0: i32, %arg1: memref<1x384xf32, #tpu.memory_space<vmem>>, %arg2: memref<1x16x384xf32, #tpu.memory_space<vmem>>, %arg3: memref<16x144xf32, #tpu.memory_space<vmem>>, %arg4: memref<16x1xf32, #tpu.memory_space<vmem>>, %arg5: memref<16x1xf32, #tpu.memory_space<vmem>>, %arg6: memref<16x144xf32, #tpu.memory_space<vmem>>, %arg7: memref<16x1xf32, #tpu.memory_space<vmem>>, %arg8: memref<16x1xf32, #tpu.memory_space<vmem>>, %arg9: memref<16x2xf32, #tpu.memory_space<vmem>>, %arg10: memref<16x2xf32, #tpu.memory_space<vmem>>, %arg11: memref<9xf32, #tpu.memory_space<smem>>, %arg12: memref<1x16x384xf32, #tpu.memory_space<vmem>>, %arg13: memref<144x384xf32, #tpu.memory_space<vmem>>) attributes {dimension_semantics = [#tpu.dimension_semantics<parallel>], iteration_bounds = array<i64: 2>, scalar_prefetch = 0 : i64, scratch_operands = 1 : i64, tpu.core_type = #tpu.core_type<tc>, window_params = [{pipeline_mode = #tpu.pipeline_mode<synchronous>, transform_indices = @transform_0, window_bounds = array<i64: 1, 384>}, {transform_indices = @transform_1, window_bounds = array<i64: 1, 16, 384>}, {pipeline_mode = #tpu.pipeline_mode<synchronous>, transform_indices = @transform_2, window_bounds = array<i64: 16, 144>}, {pipeline_mode = #tpu.pipeline_mode<synchronous>, transform_indices = @transform_3, window_bounds = array<i64: 16, 1>}, {pipeline_mode = #tpu.pipeline_mode<synchronous>, transform_indices = @transform_4, window_bounds = array<i64: 16, 1>}, {pipeline_mode = #tpu.pipeline_mode<synchronous>, transform_indices = @transform_5, window_bounds = array<i64: 16, 144>}, {pipeline_mode = #tpu.pipeline_mode<synchronous>, transform_indices = @transform_6, window_bounds = array<i64: 16, 1>}, {pipeline_mode = #tpu.pipeline_mode<synchronous>, transform_indices = @transform_7, window_bounds = array<i64: 16, 1>}, {pipeline_mode = #tpu.pipeline_mode<synchronous>, transform_indices = @transform_8, window_bounds = array<i64: 16, 2>}, {pipeline_mode = #tpu.pipeline_mode<synchronous>, transform_indices = @transform_9, window_bounds = array<i64: 16, 2>}, {transform_indices = @transform_10, window_bounds = array<i64: 9>}, {transform_indices = @transform_11, window_bounds = array<i64: 1, 16, 384>}]} {
    %c0 = arith.constant 0 : index
    %c0_0 = arith.constant 0 : index
    %0 = vector.load %arg1[%c0, %c0_0] : memref<1x384xf32, #tpu.memory_space<vmem>>, vector<1x384xf32>
    %c0_1 = arith.constant 0 : index
    %c0_2 = arith.constant 0 : index
    %1 = vector.load %arg3[%c0_1, %c0_2] : memref<16x144xf32, #tpu.memory_space<vmem>>, vector<16x144xf32>
    %c0_3 = arith.constant 0 : index
    %c0_4 = arith.constant 0 : index
    %2 = vector.load %arg6[%c0_3, %c0_4] : memref<16x144xf32, #tpu.memory_space<vmem>>, vector<16x144xf32>
    %c0_5 = arith.constant 0 : index
    %c0_6 = arith.constant 0 : index
    %3 = vector.load %arg4[%c0_5, %c0_6] : memref<16x1xf32, #tpu.memory_space<vmem>>, vector<16x1xf32>
    %c0_7 = arith.constant 0 : index
    %c0_8 = arith.constant 0 : index
    %4 = vector.load %arg5[%c0_7, %c0_8] : memref<16x1xf32, #tpu.memory_space<vmem>>, vector<16x1xf32>
    %c0_9 = arith.constant 0 : index
    %c0_10 = arith.constant 0 : index
    %5 = vector.load %arg7[%c0_9, %c0_10] : memref<16x1xf32, #tpu.memory_space<vmem>>, vector<16x1xf32>
    %c0_11 = arith.constant 0 : index
    %c0_12 = arith.constant 0 : index
    %6 = vector.load %arg8[%c0_11, %c0_12] : memref<16x1xf32, #tpu.memory_space<vmem>>, vector<16x1xf32>
    %c0_13 = arith.constant 0 : index
    %c0_14 = arith.constant 0 : index
    %7 = vector.load %arg9[%c0_13, %c0_14] : memref<16x2xf32, #tpu.memory_space<vmem>>, vector<16x2xf32>
    %c0_15 = arith.constant 0 : index
    %c0_16 = arith.constant 0 : index
    %8 = vector.load %arg10[%c0_15, %c0_16] : memref<16x2xf32, #tpu.memory_space<vmem>>, vector<16x2xf32>
    %c0_17 = arith.constant 0 : index
    %9 = memref.load %arg11[%c0_17] : memref<9xf32, #tpu.memory_space<smem>>
    %c1 = arith.constant 1 : index
    %10 = memref.load %arg11[%c1] : memref<9xf32, #tpu.memory_space<smem>>
    %c2 = arith.constant 2 : index
    %11 = memref.load %arg11[%c2] : memref<9xf32, #tpu.memory_space<smem>>
    %c3 = arith.constant 3 : index
    %12 = memref.load %arg11[%c3] : memref<9xf32, #tpu.memory_space<smem>>
    %c4 = arith.constant 4 : index
    %13 = memref.load %arg11[%c4] : memref<9xf32, #tpu.memory_space<smem>>
    %c5 = arith.constant 5 : index
    %14 = memref.load %arg11[%c5] : memref<9xf32, #tpu.memory_space<smem>>
    %c6 = arith.constant 6 : index
    %15 = memref.load %arg11[%c6] : memref<9xf32, #tpu.memory_space<smem>>
    %c7 = arith.constant 7 : index
    %16 = memref.load %arg11[%c7] : memref<9xf32, #tpu.memory_space<smem>>
    %c8 = arith.constant 8 : index
    %17 = memref.load %arg11[%c8] : memref<9xf32, #tpu.memory_space<smem>>
    %c0_18 = arith.constant 0 : index
    %c0_19 = arith.constant 0 : index
    %c0_20 = arith.constant 0 : index
    %18 = vector.load %arg2[%c0_18, %c0_19, %c0_20] : memref<1x16x384xf32, #tpu.memory_space<vmem>>, vector<1x16x384xf32>
    %19 = vector.shape_cast %18 : vector<1x16x384xf32> to vector<16x384xf32>
    %c19_i32 = arith.constant 19 : i32
    %20 = tpu.dynamic_rotate %19 by %c19_i32 dim 1 : vector<16x384xf32>, i32 -> vector<16x384xf32>
    %c0_21 = arith.constant 0 : index
    %c0_22 = arith.constant 0 : index
    %21 = vector.load %arg13[%c0_21, %c0_22] : memref<144x384xf32, #tpu.memory_space<vmem>>, vector<16x384xf32>
    tpu.vector_store %arg13[%c0_21, %c0_22], %20 {strides = array<i32>} : memref<144x384xf32, #tpu.memory_space<vmem>>, vector<16x384xf32>,
    %c18_i32 = arith.constant 18 : i32
    %22 = tpu.dynamic_rotate %19 by %c18_i32 dim 1 : vector<16x384xf32>, i32 -> vector<16x384xf32>
    %c16 = arith.constant 16 : index
    %c0_23 = arith.constant 0 : index
    %23 = vector.load %arg13[%c16, %c0_23] : memref<144x384xf32, #tpu.memory_space<vmem>>, vector<16x384xf32>
    tpu.vector_store %arg13[%c16, %c0_23], %22 {strides = array<i32>} : memref<144x384xf32, #tpu.memory_space<vmem>>, vector<16x384xf32>,
    %c17_i32 = arith.constant 17 : i32
    %24 = tpu.dynamic_rotate %19 by %c17_i32 dim 1 : vector<16x384xf32>, i32 -> vector<16x384xf32>
    %c32 = arith.constant 32 : index
    %c0_24 = arith.constant 0 : index
    %25 = vector.load %arg13[%c32, %c0_24] : memref<144x384xf32, #tpu.memory_space<vmem>>, vector<16x384xf32>
    tpu.vector_store %arg13[%c32, %c0_24], %24 {strides = array<i32>} : memref<144x384xf32, #tpu.memory_space<vmem>>, vector<16x384xf32>,
    %c1_i32 = arith.constant 1 : i32
    %26 = tpu.dynamic_rotate %19 by %c1_i32 dim 1 : vector<16x384xf32>, i32 -> vector<16x384xf32>
    %c48 = arith.constant 48 : index
    %c0_25 = arith.constant 0 : index
    %27 = vector.load %arg13[%c48, %c0_25] : memref<144x384xf32, #tpu.memory_space<vmem>>, vector<16x384xf32>
    tpu.vector_store %arg13[%c48, %c0_25], %26 {strides = array<i32>} : memref<144x384xf32, #tpu.memory_space<vmem>>, vector<16x384xf32>,
    %c64 = arith.constant 64 : index
    %c0_26 = arith.constant 0 : index
    %28 = vector.load %arg13[%c64, %c0_26] : memref<144x384xf32, #tpu.memory_space<vmem>>, vector<16x384xf32>
    tpu.vector_store %arg13[%c64, %c0_26], %19 {strides = array<i32>} : memref<144x384xf32, #tpu.memory_space<vmem>>, vector<16x384xf32>,
    %c383_i32 = arith.constant 383 : i32
    %29 = tpu.dynamic_rotate %19 by %c383_i32 dim 1 : vector<16x384xf32>, i32 -> vector<16x384xf32>
    %c80 = arith.constant 80 : index
    %c0_27 = arith.constant 0 : index
    %30 = vector.load %arg13[%c80, %c0_27] : memref<144x384xf32, #tpu.memory_space<vmem>>, vector<16x384xf32>
    tpu.vector_store %arg13[%c80, %c0_27], %29 {strides = array<i32>} : memref<144x384xf32, #tpu.memory_space<vmem>>, vector<16x384xf32>,
    %c367_i32 = arith.constant 367 : i32
    %31 = tpu.dynamic_rotate %19 by %c367_i32 dim 1 : vector<16x384xf32>, i32 -> vector<16x384xf32>
    %c96 = arith.constant 96 : index
    %c0_28 = arith.constant 0 : index
    %32 = vector.load %arg13[%c96, %c0_28] : memref<144x384xf32, #tpu.memory_space<vmem>>, vector<16x384xf32>
    tpu.vector_store %arg13[%c96, %c0_28], %31 {strides = array<i32>} : memref<144x384xf32, #tpu.memory_space<vmem>>, vector<16x384xf32>,
    %c366_i32 = arith.constant 366 : i32
    %33 = tpu.dynamic_rotate %19 by %c366_i32 dim 1 : vector<16x384xf32>, i32 -> vector<16x384xf32>
    %c112 = arith.constant 112 : index
    %c0_29 = arith.constant 0 : index
    %34 = vector.load %arg13[%c112, %c0_29] : memref<144x384xf32, #tpu.memory_space<vmem>>, vector<16x384xf32>
    tpu.vector_store %arg13[%c112, %c0_29], %33 {strides = array<i32>} : memref<144x384xf32, #tpu.memory_space<vmem>>, vector<16x384xf32>,
    %c365_i32 = arith.constant 365 : i32
    %35 = tpu.dynamic_rotate %19 by %c365_i32 dim 1 : vector<16x384xf32>, i32 -> vector<16x384xf32>
    %c128 = arith.constant 128 : index
    %c0_30 = arith.constant 0 : index
    %36 = vector.load %arg13[%c128, %c0_30] : memref<144x384xf32, #tpu.memory_space<vmem>>, vector<16x384xf32>
    tpu.vector_store %arg13[%c128, %c0_30], %35 {strides = array<i32>} : memref<144x384xf32, #tpu.memory_space<vmem>>, vector<16x384xf32>,
    %c0_31 = arith.constant 0 : index
    %c0_32 = arith.constant 0 : index
    %37 = vector.load %arg13[%c0_31, %c0_32] : memref<144x384xf32, #tpu.memory_space<vmem>>, vector<144x384xf32>
    %cst = arith.constant dense<0.000000e+00> : vector<16x384xf32>
    %38 = tpu.matmul %1, %37, %cst {dimension_numbers = #tpu.dot_dimension_numbers<[1], [0], [0], [1], [0, 0, 1, 1], [], []>} : vector<16x144xf32>, vector<144x384xf32>, vector<16x384xf32> -> vector<16x384xf32>
    %39 = vector.broadcast %3 : vector<16x1xf32> to vector<16x384xf32>
    %40 = arith.mulf %38, %39 : vector<16x384xf32>
    %41 = vector.broadcast %4 : vector<16x1xf32> to vector<16x384xf32>
    %42 = arith.addf %40, %41 : vector<16x384xf32>
    %cst_33 = arith.constant 0.000000e+00 : f32
    %43 = vector.broadcast %cst_33 : f32 to vector<16x384xf32>
    %44 = arith.maximumf %42, %43 : vector<16x384xf32>
    %45 = vector.broadcast %0 : vector<1x384xf32> to vector<16x384xf32>
    %46 = arith.mulf %44, %45 : vector<16x384xf32>
    %c19_i32_34 = arith.constant 19 : i32
    %47 = tpu.dynamic_rotate %46 by %c19_i32_34 dim 1 : vector<16x384xf32>, i32 -> vector<16x384xf32>
    %c0_35 = arith.constant 0 : index
    %c0_36 = arith.constant 0 : index
    %48 = vector.load %arg13[%c0_35, %c0_36] : memref<144x384xf32, #tpu.memory_space<vmem>>, vector<16x384xf32>
    tpu.vector_store %arg13[%c0_35, %c0_36], %47 {strides = array<i32>} : memref<144x384xf32, #tpu.memory_space<vmem>>, vector<16x384xf32>,
    %c18_i32_37 = arith.constant 18 : i32
    %49 = tpu.dynamic_rotate %46 by %c18_i32_37 dim 1 : vector<16x384xf32>, i32 -> vector<16x384xf32>
    %c16_38 = arith.constant 16 : index
    %c0_39 = arith.constant 0 : index
    %50 = vector.load %arg13[%c16_38, %c0_39] : memref<144x384xf32, #tpu.memory_space<vmem>>, vector<16x384xf32>
    tpu.vector_store %arg13[%c16_38, %c0_39], %49 {strides = array<i32>} : memref<144x384xf32, #tpu.memory_space<vmem>>, vector<16x384xf32>,
    %c17_i32_40 = arith.constant 17 : i32
    %51 = tpu.dynamic_rotate %46 by %c17_i32_40 dim 1 : vector<16x384xf32>, i32 -> vector<16x384xf32>
    %c32_41 = arith.constant 32 : index
    %c0_42 = arith.constant 0 : index
    %52 = vector.load %arg13[%c32_41, %c0_42] : memref<144x384xf32, #tpu.memory_space<vmem>>, vector<16x384xf32>
    tpu.vector_store %arg13[%c32_41, %c0_42], %51 {strides = array<i32>} : memref<144x384xf32, #tpu.memory_space<vmem>>, vector<16x384xf32>,
    %c1_i32_43 = arith.constant 1 : i32
    %53 = tpu.dynamic_rotate %46 by %c1_i32_43 dim 1 : vector<16x384xf32>, i32 -> vector<16x384xf32>
    %c48_44 = arith.constant 48 : index
    %c0_45 = arith.constant 0 : index
    %54 = vector.load %arg13[%c48_44, %c0_45] : memref<144x384xf32, #tpu.memory_space<vmem>>, vector<16x384xf32>
    tpu.vector_store %arg13[%c48_44, %c0_45], %53 {strides = array<i32>} : memref<144x384xf32, #tpu.memory_space<vmem>>, vector<16x384xf32>,
    %c64_46 = arith.constant 64 : index
    %c0_47 = arith.constant 0 : index
    %55 = vector.load %arg13[%c64_46, %c0_47] : memref<144x384xf32, #tpu.memory_space<vmem>>, vector<16x384xf32>
    tpu.vector_store %arg13[%c64_46, %c0_47], %46 {strides = array<i32>} : memref<144x384xf32, #tpu.memory_space<vmem>>, vector<16x384xf32>,
    %c383_i32_48 = arith.constant 383 : i32
    %56 = tpu.dynamic_rotate %46 by %c383_i32_48 dim 1 : vector<16x384xf32>, i32 -> vector<16x384xf32>
    %c80_49 = arith.constant 80 : index
    %c0_50 = arith.constant 0 : index
    %57 = vector.load %arg13[%c80_49, %c0_50] : memref<144x384xf32, #tpu.memory_space<vmem>>, vector<16x384xf32>
    tpu.vector_store %arg13[%c80_49, %c0_50], %56 {strides = array<i32>} : memref<144x384xf32, #tpu.memory_space<vmem>>, vector<16x384xf32>,
    %c367_i32_51 = arith.constant 367 : i32
    %58 = tpu.dynamic_rotate %46 by %c367_i32_51 dim 1 : vector<16x384xf32>, i32 -> vector<16x384xf32>
    %c96_52 = arith.constant 96 : index
    %c0_53 = arith.constant 0 : index
    %59 = vector.load %arg13[%c96_52, %c0_53] : memref<144x384xf32, #tpu.memory_space<vmem>>, vector<16x384xf32>
    tpu.vector_store %arg13[%c96_52, %c0_53], %58 {strides = array<i32>} : memref<144x384xf32, #tpu.memory_space<vmem>>, vector<16x384xf32>,
    %c366_i32_54 = arith.constant 366 : i32
    %60 = tpu.dynamic_rotate %46 by %c366_i32_54 dim 1 : vector<16x384xf32>, i32 -> vector<16x384xf32>
    %c112_55 = arith.constant 112 : index
    %c0_56 = arith.constant 0 : index
    %61 = vector.load %arg13[%c112_55, %c0_56] : memref<144x384xf32, #tpu.memory_space<vmem>>, vector<16x384xf32>
    tpu.vector_store %arg13[%c112_55, %c0_56], %60 {strides = array<i32>} : memref<144x384xf32, #tpu.memory_space<vmem>>, vector<16x384xf32>,
    %c365_i32_57 = arith.constant 365 : i32
    %62 = tpu.dynamic_rotate %46 by %c365_i32_57 dim 1 : vector<16x384xf32>, i32 -> vector<16x384xf32>
    %c128_58 = arith.constant 128 : index
    %c0_59 = arith.constant 0 : index
    %63 = vector.load %arg13[%c128_58, %c0_59] : memref<144x384xf32, #tpu.memory_space<vmem>>, vector<16x384xf32>
    tpu.vector_store %arg13[%c128_58, %c0_59], %62 {strides = array<i32>} : memref<144x384xf32, #tpu.memory_space<vmem>>, vector<16x384xf32>,
    %c0_60 = arith.constant 0 : index
    %c0_61 = arith.constant 0 : index
    %64 = vector.load %arg13[%c0_60, %c0_61] : memref<144x384xf32, #tpu.memory_space<vmem>>, vector<144x384xf32>
    %cst_62 = arith.constant dense<0.000000e+00> : vector<16x384xf32>
    %65 = tpu.matmul %2, %64, %cst_62 {dimension_numbers = #tpu.dot_dimension_numbers<[1], [0], [0], [1], [0, 0, 1, 1], [], []>} : vector<16x144xf32>, vector<144x384xf32>, vector<16x384xf32> -> vector<16x384xf32>
    %66 = vector.broadcast %5 : vector<16x1xf32> to vector<16x384xf32>
    %67 = arith.mulf %65, %66 : vector<16x384xf32>
    %68 = vector.broadcast %6 : vector<16x1xf32> to vector<16x384xf32>
    %69 = arith.addf %67, %68 : vector<16x384xf32>
    %cst_63 = arith.constant 5.000000e-01 : f32
    %70 = vector.broadcast %cst_63 : f32 to vector<1x384xf32>
    %71 = arith.cmpf ogt, %0, %70 : vector<1x384xf32>
    %cst_64 = arith.constant -1.000000e+30 : f32
    %72 = vector.shape_cast %71 : vector<1x384xi1> to vector<1x384xi1>
    %73 = vector.broadcast %72 : vector<1x384xi1> to vector<16x384xi1>
    %74 = vector.broadcast %cst_64 : f32 to vector<16x384xf32>
    %75 = arith.select %73, %69, %74 : vector<16x384xi1>, vector<16x384xf32>
    %cst_65 = arith.constant dense<0xFF800000> : vector<16xf32>
    %76 = vector.multi_reduction <maximumf>, %75, %cst_65 [1] : vector<16x384xf32> to vector<16xf32>
    %77 = vector.shape_cast %76 : vector<16xf32> to vector<16x1xf32>
    %78 = vector.broadcast %77 : vector<16x1xf32> to vector<16x2xf32>
    %79 = arith.mulf %7, %78 : vector<16x2xf32>
    %cst_66 = arith.constant dense<0.000000e+00> : vector<2xf32>
    %80 = vector.multi_reduction <add>, %79, %cst_66 [0] : vector<16x2xf32> to vector<2xf32>
    %81 = vector.shape_cast %80 : vector<2xf32> to vector<1x2xf32>
    %cst_67 = arith.constant 0.000000e+00 : f32
    %82 = vector.broadcast %cst_67 : f32 to vector<1x2xf32>
    %83 = arith.maximumf %81, %82 : vector<1x2xf32>
    %84 = vector.broadcast %83 : vector<1x2xf32> to vector<16x2xf32>
    %85 = arith.mulf %8, %84 : vector<16x2xf32>
    %cst_68 = arith.constant dense<0.000000e+00> : vector<16xf32>
    %86 = vector.multi_reduction <add>, %85, %cst_68 [1] : vector<16x2xf32> to vector<16xf32>
    %87 = vector.shape_cast %86 : vector<16xf32> to vector<16x1xf32>
    %cst_69 = arith.constant 0.000000e+00 : f32
    %88 = vector.broadcast %cst_69 : f32 to vector<16x1xf32>
    %89 = arith.subf %88, %87 : vector<16x1xf32>
    %90 = math.exp %89 : vector<16x1xf32>
    %cst_70 = arith.constant 1.000000e+00 : f32
    %91 = vector.broadcast %cst_70 : f32 to vector<16x1xf32>
    %92 = arith.addf %91, %90 : vector<16x1xf32>
    %93 = tpu.reciprocal %92 {approx = true} : vector<16x1xf32> -> vector<16x1xf32>
    %94 = vector.broadcast %93 : vector<16x1xf32> to vector<16x384xf32>
    %95 = arith.mulf %69, %94 : vector<16x384xf32>
    %cst_71 = arith.constant dense<0xFF800000> : vector<384xf32>
    %96 = vector.multi_reduction <maximumf>, %95, %cst_71 [0] : vector<16x384xf32> to vector<384xf32>
    %97 = vector.shape_cast %96 : vector<384xf32> to vector<1x384xf32>
    %98 = arith.mulf %97, %0 : vector<1x384xf32>
    %c19_i32_72 = arith.constant 19 : i32
    %99 = tpu.dynamic_rotate %98 by %c19_i32_72 dim 1 : vector<1x384xf32>, i32 -> vector<1x384xf32>
    %100 = vector.broadcast %9 : f32 to vector<1x384xf32>
    %101 = arith.mulf %100, %99 : vector<1x384xf32>
    %c18_i32_73 = arith.constant 18 : i32
    %102 = tpu.dynamic_rotate %98 by %c18_i32_73 dim 1 : vector<1x384xf32>, i32 -> vector<1x384xf32>
    %103 = vector.broadcast %10 : f32 to vector<1x384xf32>
    %104 = arith.mulf %103, %102 : vector<1x384xf32>
    %105 = arith.addf %101, %104 : vector<1x384xf32>
    %c17_i32_74 = arith.constant 17 : i32
    %106 = tpu.dynamic_rotate %98 by %c17_i32_74 dim 1 : vector<1x384xf32>, i32 -> vector<1x384xf32>
    %107 = vector.broadcast %11 : f32 to vector<1x384xf32>
    %108 = arith.mulf %107, %106 : vector<1x384xf32>
    %109 = arith.addf %105, %108 : vector<1x384xf32>
    %c1_i32_75 = arith.constant 1 : i32
    %110 = tpu.dynamic_rotate %98 by %c1_i32_75 dim 1 : vector<1x384xf32>, i32 -> vector<1x384xf32>
    %111 = vector.broadcast %12 : f32 to vector<1x384xf32>
    %112 = arith.mulf %111, %110 : vector<1x384xf32>
    %113 = arith.addf %109, %112 : vector<1x384xf32>
    %114 = vector.broadcast %13 : f32 to vector<1x384xf32>
    %115 = arith.mulf %114, %98 : vector<1x384xf32>
    %116 = arith.addf %113, %115 : vector<1x384xf32>
    %c383_i32_76 = arith.constant 383 : i32
    %117 = tpu.dynamic_rotate %98 by %c383_i32_76 dim 1 : vector<1x384xf32>, i32 -> vector<1x384xf32>
    %118 = vector.broadcast %14 : f32 to vector<1x384xf32>
    %119 = arith.mulf %118, %117 : vector<1x384xf32>
    %120 = arith.addf %116, %119 : vector<1x384xf32>
    %c367_i32_77 = arith.constant 367 : i32
    %121 = tpu.dynamic_rotate %98 by %c367_i32_77 dim 1 : vector<1x384xf32>, i32 -> vector<1x384xf32>
    %122 = vector.broadcast %15 : f32 to vector<1x384xf32>
    %123 = arith.mulf %122, %121 : vector<1x384xf32>
    %124 = arith.addf %120, %123 : vector<1x384xf32>
    %c366_i32_78 = arith.constant 366 : i32
    %125 = tpu.dynamic_rotate %98 by %c366_i32_78 dim 1 : vector<1x384xf32>, i32 -> vector<1x384xf32>
    %126 = vector.broadcast %16 : f32 to vector<1x384xf32>
    %127 = arith.mulf %126, %125 : vector<1x384xf32>
    %128 = arith.addf %124, %127 : vector<1x384xf32>
    %c365_i32_79 = arith.constant 365 : i32
    %129 = tpu.dynamic_rotate %98 by %c365_i32_79 dim 1 : vector<1x384xf32>, i32 -> vector<1x384xf32>
    %130 = vector.broadcast %17 : f32 to vector<1x384xf32>
    %131 = arith.mulf %130, %129 : vector<1x384xf32>
    %132 = arith.addf %128, %131 : vector<1x384xf32>
    %cst_80 = arith.constant 0.000000e+00 : f32
    %133 = vector.broadcast %cst_80 : f32 to vector<1x384xf32>
    %134 = arith.subf %133, %132 : vector<1x384xf32>
    %135 = math.exp %134 : vector<1x384xf32>
    %cst_81 = arith.constant 1.000000e+00 : f32
    %136 = vector.broadcast %cst_81 : f32 to vector<1x384xf32>
    %137 = arith.addf %136, %135 : vector<1x384xf32>
    %138 = tpu.reciprocal %137 {approx = true} : vector<1x384xf32> -> vector<1x384xf32>
    %139 = vector.broadcast %138 : vector<1x384xf32> to vector<16x384xf32>
    %140 = arith.mulf %95, %139 : vector<16x384xf32>
    %141 = arith.addf %140, %19 : vector<16x384xf32>
    %cst_82 = arith.constant 0.000000e+00 : f32
    %142 = vector.broadcast %cst_82 : f32 to vector<16x384xf32>
    %143 = arith.maximumf %141, %142 : vector<16x384xf32>
    %c0_83 = arith.constant 0 : index
    %c0_84 = arith.constant 0 : index
    %c0_85 = arith.constant 0 : index
    %144 = vector.load %arg12[%c0_83, %c0_84, %c0_85] : memref<1x16x384xf32, #tpu.memory_space<vmem>>, vector<1x16x384xf32>
    %145 = vector.shape_cast %144 : vector<1x16x384xf32> to vector<16x384xf32>
    %146 = vector.shape_cast %143 : vector<16x384xf32> to vector<1x16x384xf32>
    tpu.vector_store %arg12[%c0_83, %c0_84, %c0_85], %146 {strides = array<i32>} : memref<1x16x384xf32, #tpu.memory_space<vmem>>, vector<1x16x384xf32>,
    return
  }
  func.func @transform_0(%arg0: i32) -> (i32, i32) {
    %c0_i32 = arith.constant 0 : i32
    %c0_i32_0 = arith.constant 0 : i32
    %c0_i32_1 = arith.constant 0 : i32
    return %c0_i32, %c0_i32_0 : i32, i32
  }
  func.func @transform_1(%arg0: i32) -> (i32, i32, i32) {
    %c0_i32 = arith.constant 0 : i32
    %c0_i32_0 = arith.constant 0 : i32
    %c0_i32_1 = arith.constant 0 : i32
    return %arg0, %c0_i32, %c0_i32_0 : i32, i32, i32
  }
  func.func @transform_2(%arg0: i32) -> (i32, i32) {
    %c0_i32 = arith.constant 0 : i32
    %c0_i32_0 = arith.constant 0 : i32
    %c0_i32_1 = arith.constant 0 : i32
    return %c0_i32, %c0_i32_0 : i32, i32
  }
  func.func @transform_3(%arg0: i32) -> (i32, i32) {
    %c0_i32 = arith.constant 0 : i32
    %c0_i32_0 = arith.constant 0 : i32
    %c0_i32_1 = arith.constant 0 : i32
    return %c0_i32, %c0_i32_0 : i32, i32
  }
  func.func @transform_4(%arg0: i32) -> (i32, i32) {
    %c0_i32 = arith.constant 0 : i32
    %c0_i32_0 = arith.constant 0 : i32
    %c0_i32_1 = arith.constant 0 : i32
    return %c0_i32, %c0_i32_0 : i32, i32
  }
  func.func @transform_5(%arg0: i32) -> (i32, i32) {
    %c0_i32 = arith.constant 0 : i32
    %c0_i32_0 = arith.constant 0 : i32
    %c0_i32_1 = arith.constant 0 : i32
    return %c0_i32, %c0_i32_0 : i32, i32
  }
  func.func @transform_6(%arg0: i32) -> (i32, i32) {
    %c0_i32 = arith.constant 0 : i32
    %c0_i32_0 = arith.constant 0 : i32
    %c0_i32_1 = arith.constant 0 : i32
    return %c0_i32, %c0_i32_0 : i32, i32
  }
  func.func @transform_7(%arg0: i32) -> (i32, i32) {
    %c0_i32 = arith.constant 0 : i32
    %c0_i32_0 = arith.constant 0 : i32
    %c0_i32_1 = arith.constant 0 : i32
    return %c0_i32, %c0_i32_0 : i32, i32
  }
  func.func @transform_8(%arg0: i32) -> (i32, i32) {
    %c0_i32 = arith.constant 0 : i32
    %c0_i32_0 = arith.constant 0 : i32
    %c0_i32_1 = arith.constant 0 : i32
    return %c0_i32, %c0_i32_0 : i32, i32
  }
  func.func @transform_9(%arg0: i32) -> (i32, i32) {
    %c0_i32 = arith.constant 0 : i32
    %c0_i32_0 = arith.constant 0 : i32
    %c0_i32_1 = arith.constant 0 : i32
    return %c0_i32, %c0_i32_0 : i32, i32
  }
  func.func @transform_10(%arg0: i32) -> i32 {
    %c0_i32 = arith.constant 0 : i32
    %c0_i32_0 = arith.constant 0 : i32
    return %c0_i32 : i32
  }
  func.func @transform_11(%arg0: i32) -> (i32, i32, i32) {
    %c0_i32 = arith.constant 0 : i32
    %c0_i32_0 = arith.constant 0 : i32
    %c0_i32_1 = arith.constant 0 : i32
    return %arg0, %c0_i32, %c0_i32_0 : i32, i32, i32
  }
}

</mosaic_0001>

<bundles_post_ra>
// kernel: basic_block_forward.1
= control target key start
LH: loop header
LB: loop body
LE: loop exit
PB: predicated region body
PF: predicated region fallthrough
CT: control target
= control target key end

     0   :  { %16 = vsyncpa [#allocation4], 0  ;;  %s2251_s17 = smov 0   ;;  %s2922_s0 = inlined_call_operand.vmem [shape: f32[1,384], index: 0, kind: input, shape index: {}]   ;;  %s2923_s1 = inlined_call_operand.vmem [shape: f32[2,16,384], index: 1, kind: input, shape index: {}]   ;;  %s2924_s2 = inlined_call_operand.vmem [shape: f32[16,144], index: 2, kind: input, shape index: {}]   ;;  %s2925_s3 = inlined_call_operand.vmem [shape: f32[16,1], index: 3, kind: input, shape index: {}]   ;;  %s2926_s4 = inlined_call_operand.vmem [shape: f32[16,1], index: 4, kind: input, shape index: {}]   ;;  %s2927_s5 = inlined_call_operand.vmem [shape: f32[16,144], index: 5, kind: input, shape index: {}]   ;;  %s2928_s6 = inlined_call_operand.vmem [shape: f32[16,1], index: 6, kind: input, shape index: {}]   ;;  %s2929_s7 = inlined_call_operand.vmem [shape: f32[16,1], index: 7, kind: input, shape index: {}]   ;;  %s2930_s8 = inlined_call_operand.vmem [shape: f32[16,2], index: 8, kind: input, shape index: {}]   ;;  %s2931_s9 = inlined_call_operand.vmem [shape: f32[16,2], index: 9, kind: input, shape index: {}]   ;;  %s2932_s10 = inlined_call_operand.vmem [shape: f32[9], index: 10, kind: input, shape index: {}]   ;;  %s2933_s11 = inlined_call_operand.vmem [shape: f32[2,16,384], index: 11, kind: output, shape index: {}]  }
   0x1 LB: > { %s1702_s18 = sadd.s32 4294967295, %s2178_s17   ;;  %p1704_p0 = scmp.ge.s32.totalorder %s2178_s17, 1  ;;  %s2178_s17 = sphi %s2251_s17, %s22_s17  }
   0x2   : > { %p289_p1 = scmp.lt.s32.totalorder %s2178_s17, 3  ;;  %s329_s21 = sshll.u32 %s2932_s10, 4  ;;  %s330_s21 = int_to_ptr.vmem [resolvable:$true] %s329_s21 }
   0x3   : > { %p1864_p3 = scmp.eq.s32.totalorder %s1702_s18, 0  ;;  %s2153_s23 = scalar_lea.vmem %s330_s21, 16 }
   0x4   : > { %p2262_p2 = pnand %p1704_p0, %p289_p1  ;;  %p2154_p6 = scmp.ne.s32.totalorder %s330_s21, %s2153_s23 }
   0x5   : > { %p2161_p10 = scmp.lt.s32.totalorder %s330_s21, %s330_s21  ;;  %p2162_p11 = scmp.lt.s32.totalorder %s2153_s23, %s2153_s23 }
   0x6   : > { %p1860_p4 = pneg %p2262_p2 }
   0x7   : > { %p2163_p12 = por %p2162_p11, %p2161_p10 }
   0x8   : > { %p1861_p5 = pnand %p1864_p3, %p1860_p4 }
   0xa   : > { %p2155_p7 = pneg %p1861_p5 }
   0xc   : > { %p2156_p8 = pnand %p2155_p7, %p2154_p6 }
   0xe   : > { %p2157_p9 = pneg %p2156_p8 }
  0x10   : > { %p2164_p13 = pnand %p2163_p12, %p2157_p9 }
  0x12   : > { %2167 = shalt.err (!%p2164_p13)
}
  0x13   : > { %s2180_s24 = smov [#allocation3]   ;;  %350 = sbr.rel (%p2262_p2) target bundleno = 1382 (0x566), region = 64 }
  0x14   : > { %1863 = dma.vmem_to_smem (!%p1861_p5), %s330_s21, 16, %s2180_s24, [#allocation4]  }
  0x1a   : > { %2173 = dma.done.wait (%p1864_p3), [#allocation4], 16  }
  0x1b   : > { %2175 = vsyncadd (%p1864_p3), [#allocation4], 4294967280 }
  0x1c   : > { %356 = sfence }
  0x1d   : > { %p391_p0 = scmp.lt.s32.totalorder %s1702_s18, 1  ;;  %v2181_v0 = vmov 0.0|0.0   ;;  %s2182_s29 = smov 19   ;;  %v403_v10 = vld [vmem:[%s2924_s2 + $0x8] sm:$0xff]  ;;  %vm699_vm0 = vcmask 130048   ;;  %v2190_v12 = vmov 0   ;;  %v449_v16 = vlaneseq }
  0x1e   : > { %1765 = vmatprep.subr.bf16.mxu1 %v2181_v0  ;;  %s2183_s30 = smov 18   ;;  %s2184_s12 = smov 17   ;;  %1721 = vmatprep.mubr.msk.f32.mxu1 %vm699_vm0, %v403_v10  ;;  %v411_v11 = vld [vmem:[%s2925_s3 + $0x8] sm:$0xff]  ;;  %v410_v13 = vld [vmem:[%s2925_s3] sm:$0xff]  ;;  %vm1393_vm13 = vcmask 15360  }
  0x1f   : > { %s2940_s18 = smov (!%p391_p0, %s1702_s18), 1  ;;  %s2185_s13 = smov 1   ;;  %1719 = vmatprep.mubr.msk.f32.mxu0 %vm699_vm0, %v403_v10  ;;  %2006 = vset.pattern.permute.xlu1 %v2190_v12  ;;  %v412_v14 = vld [vmem:[%s2926_s4] sm:$0xff]  ;;  %v413_v15 = vld [vmem:[%s2926_s4 + $0x8] sm:$0xff]  ;;  %v2352_v18 = vand.u32 127, %v449_v16 }
  0x20   : > { %s2934_s25 = smul.u32 48, %s2940_s18  ;;  %s2186_s14 = smov 127   ;;  %2005 = vset.pattern.permute.xlu0 %v2190_v12 }
  0x21   : > { %s2187_s15 = smov 111   ;;  %s2188_s16 = smov 110   ;;  %vm451_vm1 = vcmp.lt.s32.totalorder %v2352_v18, 19  ;;  %vm476_vm2 = vcmp.lt.s32.totalorder %v2352_v18, 18  ;;  %vm501_vm3 = vcmp.lt.s32.totalorder %v2352_v18, 17  ;;  %vm526_vm4 = vcmp.lt.s32.totalorder %v2352_v18, 1 }
  0x22   : > { %s2281_s28 = scalar_lea.vmem %s2923_s1, %s2934_s25  ;;  %s2189_s21 = smov 109   ;;  %vm557_vm5 = vcmp.lt.s32.totalorder %v2352_v18, 127  ;;  %vm582_vm6 = vcmp.lt.s32.totalorder %v2352_v18, 111  ;;  %vm607_vm7 = vcmp.lt.s32.totalorder %v2352_v18, 110  ;;  %vm632_vm8 = vcmp.lt.s32.totalorder %v2352_v18, 109 }
  0x23   : > { %v2285_v1 = vld [vmem:[%s2281_s28 + $0x10] sm:$0xff]  ;;  %v2288_v2 = vld [vmem:[%s2281_s28 + $0x28] sm:$0xff]  ;;  %v2291_v3 = vld [vmem:[%s2281_s28] sm:$0xff]  ;;  %s1718_s25 = sld [smem:[#allocation3 + $0x8]]  ;;  %s2938_s22 = smul.u32 48, %s2940_s18 }
  0x24   : > { %v1895_v4 = vpack.i.bf16 %v2288_v2, %v2285_v1  ;;  %v2296_v5 = vld [vmem:[%s2281_s28 + $0x18] sm:$0xff]  ;;  %v2299_v6 = vld [vmem:[%s2281_s28 + $0x8] sm:$0xff]  ;;  %v2302_v7 = vld [vmem:[%s2281_s28 + $0x20] sm:$0xff] }
  0x25   : > { %v1885_v8 = vpack.i.bf16 %v2296_v5, %v2291_v3  ;;  %v1890_v9 = vpack.i.bf16 %v2302_v7, %v2299_v6  ;;  %s400_s26 = scalar_lea.vmem %s2933_s11, %s2938_s22 }
  0x26   : > { %1896 = vrot.lane.b32.xlu1 %v1895_v4, %s2182_s29 }
  0x27   : > { %1886 = vrot.lane.b32.xlu0 %v1885_v8, %s2182_s29 }
  0x2a   : > { %1901 = vrot.lane.b32.xlu1 %v1885_v8, %s2183_s30 }
  0x2b   : > { %1891 = vrot.lane.b32.xlu0 %v1890_v9, %s2182_s29 }
  0x2e   : > { %1911 = vrot.lane.b32.xlu1 %v1895_v4, %s2183_s30 }
  0x2f   : > { %1906 = vrot.lane.b32.xlu0 %v1890_v9, %s2183_s30 }
  0x32   : > { %1921 = vrot.lane.b32.xlu1 %v1890_v9, %s2184_s12 }
  0x33   : > { %1916 = vrot.lane.b32.xlu0 %v1885_v8, %s2184_s12 }
  0x36   : > { %1931 = vrot.lane.b32.xlu1 %v1885_v8, %s2185_s13 }
  0x37   : > { %1926 = vrot.lane.b32.xlu0 %v1895_v4, %s2184_s12 }
  0x3a   : > { %1941 = vrot.lane.b32.xlu1 %v1895_v4, %s2185_s13 }
  0x3b   : > { %1936 = vrot.lane.b32.xlu0 %v1890_v9, %s2185_s13 }
  0x3e   : > { %1951 = vrot.lane.b32.xlu1 %v1895_v4, %s2186_s14 }
  0x3f   : > { %1946 = vrot.lane.b32.xlu0 %v1890_v9, %s2186_s14 }
  0x42   : > { %1961 = vrot.lane.b32.xlu1 %v1890_v9, %s2187_s15 }
  0x43   : > { %1956 = vrot.lane.b32.xlu0 %v1885_v8, %s2186_s14 }
  0x46   : > { %1971 = vrot.lane.b32.xlu1 %v1885_v8, %s2187_s15 }
  0x47   : > { %1966 = vrot.lane.b32.xlu0 %v1895_v4, %s2187_s15 }
  0x4a   : > { %1981 = vrot.lane.b32.xlu1 %v1895_v4, %s2188_s16 }
  0x4b   : > { %1976 = vrot.lane.b32.xlu0 %v1890_v9, %s2188_s16 }
  0x4e   : > { %1991 = vrot.lane.b32.xlu1 %v1890_v9, %s2189_s21 }
  0x4f   : > { %1986 = vrot.lane.b32.xlu0 %v1885_v8, %s2188_s16 }
  0x52   : > { %2001 = vrot.lane.b32.xlu1 %v1885_v8, %s2189_s21 }
  0x53   : > { %1996 = vrot.lane.b32.xlu0 %v1895_v4, %s2189_s21 }
  0x56   : > { %865 = vperm.xlu1 %2006, %v411_v11  }
  0x57   : > { %860 = vperm.xlu0 %2005, %v410_v13  }
  0x5a   : > { %876 = vperm.xlu1 %2006, %v412_v14  }
  0x5b   : > { %881 = vperm.xlu0 %2005, %v413_v15  }
  0x98   : > { %v1897_v17 = vpop.permute.xlu1 %1896 }
  0x99   : > { %v1887_v19 = vpop.permute.xlu0 %1886  ;;  %v1899_v20 = vunpack.i.h.bf16 %v1897_v17  ;;  %v1898_v21 = vunpack.i.l.bf16 %v1897_v17 }
  0x9a   : > { %v1889_v22 = vunpack.i.h.bf16 %v1887_v19  ;;  %v1888_v23 = vunpack.i.l.bf16 %v1887_v19 }
  0x9c   : > { %v1902_v24 = vpop.permute.xlu1 %1901  ;;  %v456_v30 = vsel %vm451_vm1, %v1898_v21, %v1888_v23  ;;  %v457_v31 = vsel %vm451_vm1, %v1899_v20, %v1889_v22 }
  0x9d   : > { %v1892_v25 = vpop.permute.xlu0 %1891  ;;  %v1904_v28 = vunpack.i.h.bf16 %v1902_v24  ;;  %v1903_v29 = vunpack.i.l.bf16 %v1902_v24  ;;  %v1731_v44 = vpack.c.bf16 %v457_v31, %v456_v30 }
  0x9e   : > { %v1894_v26 = vunpack.i.h.bf16 %v1892_v25  ;;  %v1893_v27 = vunpack.i.l.bf16 %v1892_v25 }
  0xa0   : > { %v1912_v32 = vpop.permute.xlu1 %1911  ;;  %v454_v33 = vsel %vm451_vm1, %v1888_v23, %v1893_v27  ;;  %v455_v34 = vsel %vm451_vm1, %v1889_v22, %v1894_v26  ;;  %v452_v35 = vsel %vm451_vm1, %v1893_v27, %v1898_v21  ;;  %v453_v36 = vsel %vm451_vm1, %v1894_v26, %v1899_v20 }
  0xa1   : > { %v1914_v37 = vunpack.i.h.bf16 %v1912_v32  ;;  %v1913_v38 = vunpack.i.l.bf16 %v1912_v32  ;;  %v1907_v39 = vpop.permute.xlu0 %1906  ;;  %v1729_v40 = vpack.c.bf16 %v455_v34, %v454_v33  ;;  %v1766_v41 = vpack.c.bf16 %v453_v36, %v452_v35 }
  0xa2   : > { %v1909_v42 = vunpack.i.h.bf16 %v1907_v39  ;;  %v1908_v43 = vunpack.i.l.bf16 %v1907_v39 }
  0xa3   : > { %1730 = vmatprep.subr.bf16.mxu0 %v1729_v40  ;;  %1767 = vmatpush1.bf16.msra.mxu1 %v1766_v41  ;;  %v481_v45 = vsel %vm476_vm2, %v1913_v38, %v1903_v29  ;;  %v482_v46 = vsel %vm476_vm2, %v1914_v37, %v1904_v28  ;;  %v1778_v41 = vpack.c.bf16 %v2288_v2, %v2285_v1 }
  0xa4   : > { %1732 = vmatpush1.bf16.msra.mxu0 %v1731_v44  ;;  %v1922_v47 = vpop.permute.xlu1 %1921  ;;  %1768 = vmatprep.subr.bf16.mxu1 %v2181_v0  ;;  %v479_v48 = vsel %vm476_vm2, %v1903_v29, %v1908_v43  ;;  %v480_v49 = vsel %vm476_vm2, %v1904_v28, %v1909_v42  ;;  %v477_v50 = vsel %vm476_vm2, %v1908_v43, %v1913_v38 }
  0xa5   : > { %v1924_v51 = vunpack.i.h.bf16 %v1922_v47  ;;  %v1923_v52 = vunpack.i.l.bf16 %v1922_v47  ;;  %v1917_v53 = vpop.permute.xlu0 %1916  ;;  %v1733_v54 = vpack.c.bf16 %v480_v49, %v479_v48  ;;  %v478_v55 = vsel %vm476_vm2, %v1909_v42, %v1914_v37 }
  0xa6   : > { %v1919_v56 = vunpack.i.h.bf16 %v1917_v53  ;;  %v1918_v57 = vunpack.i.l.bf16 %v1917_v53  ;;  %v1769_v58 = vpack.c.bf16 %v478_v55, %v477_v50  ;;  %v1735_v59 = vpack.c.bf16 %v482_v46, %v481_v45 }
  0xa7   : > { %1734 = vmatprep.subr.bf16.mxu0 %v1733_v54  ;;  %v1745_v29 = vpack.c.bf16 %v2302_v7, %v2299_v6  ;;  %v1747_v43 = vpack.c.bf16 %v2296_v5, %v2291_v3 }
  0xa8   : > { %1770 = vmatpush1.bf16.msra.mxu1 %v1769_v58  ;;  %1736 = vmatpush1.bf16.msra.mxu0 %v1735_v59  ;;  %v1932_v60 = vpop.permute.xlu1 %1931  ;;  %v504_v61 = vsel %vm501_vm3, %v1918_v57, %v1923_v52  ;;  %v505_v62 = vsel %vm501_vm3, %v1919_v56, %v1924_v51 }
  0xa9   : > { %v1927_v63 = vpop.permute.xlu0 %1926  ;;  %v1737_v4 = vpack.c.bf16 %v505_v62, %v504_v61  ;;  %1771 = vmatprep.subr.bf16.mxu1 %v2181_v0  ;;  %v1934_v10 = vunpack.i.h.bf16 %v1932_v60  ;;  %v1933_v11 = vunpack.i.l.bf16 %v1932_v60 }
  0xaa   : > { %v1929_v8 = vunpack.i.h.bf16 %v1927_v63  ;;  %v1928_v9 = vunpack.i.l.bf16 %v1927_v63 }
  0xab   : > { %1738 = vmatprep.subr.bf16.mxu0 %v1737_v4 }
  0xac   : > { %v1942_v13 = vpop.permute.xlu1 %1941  ;;  %v506_v14 = vsel %vm501_vm3, %v1928_v9, %v1918_v57  ;;  %v507_v15 = vsel %vm501_vm3, %v1929_v8, %v1919_v56  ;;  %v502_v17 = vsel %vm501_vm3, %v1923_v52, %v1928_v9  ;;  %v503_v19 = vsel %vm501_vm3, %v1924_v51, %v1929_v8 }
  0xad   : > { %v1944_v20 = vunpack.i.h.bf16 %v1942_v13  ;;  %v1943_v21 = vunpack.i.l.bf16 %v1942_v13  ;;  %v1937_v22 = vpop.permute.xlu0 %1936  ;;  %v1739_v23 = vpack.c.bf16 %v507_v15, %v506_v14  ;;  %v1772_v24 = vpack.c.bf16 %v503_v19, %v502_v17 }
  0xae   : > { %v1939_v25 = vunpack.i.h.bf16 %v1937_v22  ;;  %v1938_v26 = vunpack.i.l.bf16 %v1937_v22 }
  0xaf   : > { %1740 = vmatpush1.bf16.msra.mxu0 %v1739_v23  ;;  %1773 = vmatpush1.bf16.msra.mxu1 %v1772_v24  ;;  %v531_v27 = vsel %vm526_vm4, %v1943_v21, %v1933_v11  ;;  %v532_v28 = vsel %vm526_vm4, %v1944_v20, %v1934_v10 }
  0xb0   : > { %v1952_v30 = vpop.permute.xlu1 %1951  ;;  %1774 = vmatprep.subr.bf16.mxu1 %v2181_v0  ;;  %v529_v31 = vsel %vm526_vm4, %v1933_v11, %v1938_v26  ;;  %v530_v32 = vsel %vm526_vm4, %v1934_v10, %v1939_v25  ;;  %v527_v33 = vsel %vm526_vm4, %v1938_v26, %v1943_v21  ;;  %v528_v34 = vsel %vm526_vm4, %v1939_v25, %v1944_v20 }
  0xb1   : > { %v1954_v35 = vunpack.i.h.bf16 %v1952_v30  ;;  %v1953_v36 = vunpack.i.l.bf16 %v1952_v30  ;;  %v1947_v6 = vpop.permute.xlu0 %1946  ;;  %v1741_v7 = vpack.c.bf16 %v530_v32, %v529_v31  ;;  %v1775_v37 = vpack.c.bf16 %v528_v34, %v527_v33 }
  0xb2   : > { %v1949_v38 = vunpack.i.h.bf16 %v1947_v6  ;;  %v1948_v39 = vunpack.i.l.bf16 %v1947_v6  ;;  %v1743_v40 = vpack.c.bf16 %v532_v28, %v531_v27 }
  0xb3   : > { %1742 = vmatprep.subr.bf16.mxu0 %v1741_v7  ;;  %1776 = vmatpush1.bf16.msra.mxu1 %v1775_v37 }
  0xb4   : > { %1744 = vmatpush1.bf16.msra.mxu0 %v1743_v40  ;;  %v1962_v42 = vpop.permute.xlu1 %1961  ;;  %1777 = vmatprep.subr.bf16.mxu1 %v2181_v0  ;;  %v558_v44 = vsel %vm557_vm5, %v1948_v39, %v1953_v36  ;;  %v559_v45 = vsel %vm557_vm5, %v1949_v38, %v1954_v35 }
  0xb5   : > { %v1957_v46 = vpop.permute.xlu0 %1956  ;;  %1746 = vmatprep.subr.bf16.mxu0 %v1745_v29  ;;  %v1964_v49 = vunpack.i.h.bf16 %v1962_v42  ;;  %v1749_v1 = vpack.c.bf16 %v559_v45, %v558_v44  ;;  %v1963_v2 = vunpack.i.l.bf16 %v1962_v42 }
  0xb6   : > { %v1959_v47 = vunpack.i.h.bf16 %v1957_v46  ;;  %v1958_v48 = vunpack.i.l.bf16 %v1957_v46 }
  0xb7   : > { %1779 = vmatpush1.bf16.msra.mxu1 %v1778_v41 }
  0xb8   : > { %1748 = vmatpush1.bf16.msra.mxu0 %v1747_v43  ;;  %v1972_v50 = vpop.permute.xlu1 %1971  ;;  %1780 = vmatprep.subr.bf16.mxu1 %v2181_v0  ;;  %v562_v3 = vsel %vm557_vm5, %v1953_v36, %v1958_v48  ;;  %v563_v5 = vsel %vm557_vm5, %v1954_v35, %v1959_v47  ;;  %v560_v51 = vsel %vm557_vm5, %v1958_v48, %v1948_v39 }
  0xb9   : > { %v1974_v52 = vunpack.i.h.bf16 %v1972_v50  ;;  %v1973_v53 = vunpack.i.l.bf16 %v1972_v50  ;;  %v1967_v54 = vpop.permute.xlu0 %1966  ;;  %1750 = vmatprep.subr.bf16.mxu0 %v1749_v1  ;;  %v1781_v55 = vpack.c.bf16 %v563_v5, %v562_v3  ;;  %v561_v56 = vsel %vm557_vm5, %v1959_v47, %v1949_v38  ;;  %v405_v1 = vld [vmem:[%s2924_s2 + $0x18] sm:$0xff] }
  0xba   : > { %v1969_v57 = vunpack.i.h.bf16 %v1967_v54  ;;  %v1968_v58 = vunpack.i.l.bf16 %v1967_v54  ;;  %v1751_v59 = vpack.c.bf16 %v561_v56, %v560_v51  ;;  %v2485_v3 = vshrl.u32 %v449_v16, 7 }
  0xbb   : > { %1782 = vmatpush1.bf16.msra.mxu1 %v1781_v55  ;;  %v585_v60 = vsel %vm582_vm6, %v1973_v53, %v1963_v2  ;;  %v586_v61 = vsel %vm582_vm6, %v1974_v52, %v1964_v49 }
  0xbc   : > { %1752 = vmatpush1.bf16.msra.mxu0 %v1751_v59  ;;  %v1982_v62 = vpop.permute.xlu1 %1981  ;;  %1783 = vmatprep.subr.bf16.mxu1 %v2181_v0  ;;  %v583_v63 = vsel %vm582_vm6, %v1963_v2, %v1968_v58  ;;  %v584_v4 = vsel %vm582_vm6, %v1964_v49, %v1969_v57  ;;  %v587_v8 = vsel %vm582_vm6, %v1968_v58, %v1973_v53  ;;  %v402_v49 = vld [vmem:[%s2924_s2] sm:$0xff]  ;;  %v404_v2 = vld [vmem:[%s2924_s2 + $0x10] sm:$0xff] }
  0xbd   : > { %v1984_v9 = vunpack.i.h.bf16 %v1982_v62  ;;  %v1983_v10 = vunpack.i.l.bf16 %v1982_v62  ;;  %v1977_v11 = vpop.permute.xlu0 %1976  ;;  %v1753_v13 = vpack.c.bf16 %v584_v4, %v583_v63  ;;  %v588_v14 = vsel %vm582_vm6, %v1969_v57, %v1974_v52  ;;  %v2493_v59 = vld [vmem:[%s2922_s0] sm:$0x7] }
  0xbe   : > { %v1979_v15 = vunpack.i.h.bf16 %v1977_v11  ;;  %v1978_v17 = vunpack.i.l.bf16 %v1977_v11  ;;  %v1784_v19 = vpack.c.bf16 %v588_v14, %v587_v8  ;;  %v1755_v20 = vpack.c.bf16 %v586_v61, %v585_v60 }
  0xbf   : > { %1754 = vmatprep.subr.bf16.mxu0 %v1753_v13  ;;  %v2488_v57 = vsub.s32 0, %v2485_v3  ;;  %v907_v60 = vsub.s32 2, %v2485_v3  ;;  %v903_v63 = vsub.s32 1, %v2485_v3  ;;  %vm1360_vm9 = vcmp.gt.f32.partialorder %v2493_v59, 0.5 }
  0xc0   : > { %1785 = vmatpush1.bf16.msra.mxu1 %v1784_v19  ;;  %1756 = vmatpush1.bf16.msra.mxu0 %v1755_v20  ;;  %v1992_v21 = vpop.permute.xlu1 %1991  ;;  %v608_v22 = vsel %vm607_vm7, %v1978_v17, %v1983_v10  ;;  %v609_v23 = vsel %vm607_vm7, %v1979_v15, %v1984_v9 }
  0xc1   : > { %v1987_v24 = vpop.permute.xlu0 %1986  ;;  %v1757_v25 = vpack.c.bf16 %v609_v23, %v608_v22  ;;  %1786 = vmatprep.subr.bf16.mxu1 %v2181_v0  ;;  %v1994_v28 = vunpack.i.h.bf16 %v1992_v21  ;;  %v1993_v29 = vunpack.i.l.bf16 %v1992_v21  ;;  %v2499_v13 = vrot.slane %v2493_v59, %v2488_v57 }
  0xc2   : > { %v1989_v26 = vunpack.i.h.bf16 %v1987_v24  ;;  %v1988_v27 = vunpack.i.l.bf16 %v1987_v24  ;;  %v2504_v19 = vrot.slane %v2493_v59, %v907_v60 }
  0xc3   : > { %1758 = vmatprep.subr.bf16.mxu0 %v1757_v25  ;;  %v2509_v25 = vrot.slane %v2493_v59, %v903_v63 }
  0xc4   : > { %v2002_v30 = vpop.permute.xlu1 %2001  ;;  %v610_v31 = vsel %vm607_vm7, %v1988_v27, %v1978_v17  ;;  %v611_v32 = vsel %vm607_vm7, %v1989_v26, %v1979_v15  ;;  %v612_v33 = vsel %vm607_vm7, %v1983_v10, %v1988_v27  ;;  %v613_v34 = vsel %vm607_vm7, %v1984_v9, %v1989_v26 }
  0xc5   : > { %v2004_v35 = vunpack.i.h.bf16 %v2002_v30  ;;  %v2003_v36 = vunpack.i.l.bf16 %v2002_v30  ;;  %v1997_v6 = vpop.permute.xlu0 %1996  ;;  %v1759_v7 = vpack.c.bf16 %v611_v32, %v610_v31  ;;  %v1787_v37 = vpack.c.bf16 %v613_v34, %v612_v33 }
  0xc6   : > { %v1999_v38 = vunpack.i.h.bf16 %v1997_v6  ;;  %v1998_v39 = vunpack.i.l.bf16 %v1997_v6 }
  0xc7   : > { %1760 = vmatpush1.bf16.msra.mxu0 %v1759_v7  ;;  %1788 = vmatpush1.bf16.msra.mxu1 %v1787_v37  ;;  %v635_v40 = vsel %vm632_vm8, %v2003_v36, %v1993_v29  ;;  %v636_v41 = vsel %vm632_vm8, %v2004_v35, %v1994_v28 }
  0xc8   : > { %1789 = vmatprep.subr.bf16.mxu1 %v2181_v0  ;;  %v633_v42 = vsel %vm632_vm8, %v1993_v29, %v1998_v39  ;;  %v634_v43 = vsel %vm632_vm8, %v1994_v28, %v1999_v38  ;;  %v637_v44 = vsel %vm632_vm8, %v1998_v39, %v2003_v36  ;;  %v638_v45 = vsel %vm632_vm8, %v1999_v38, %v2004_v35 }
  0xc9   : > { %v1761_v46 = vpack.c.bf16 %v634_v43, %v633_v42  ;;  %v1790_v47 = vpack.c.bf16 %v638_v45, %v637_v44  ;;  %v1763_v48 = vpack.c.bf16 %v636_v41, %v635_v40  ;;  %v407_v41 = vld [vmem:[%s2927_s5 + $0x8] sm:$0xff]  ;;  %v414_v42 = vld [vmem:[%s2928_s6] sm:$0xff] }
  0xca   : > { %v415_v43 = vld [vmem:[%s2928_s6 + $0x8] sm:$0xff]  ;;  %v416_v44 = vld [vmem:[%s2929_s7] sm:$0xff] }
  0xcb   : > { %1762 = vmatprep.subr.bf16.mxu0 %v1761_v46  ;;  %1791 = vmatpush1.bf16.msra.mxu1 %v1790_v47  ;;  %v417_v45 = vld [vmem:[%s2929_s7 + $0x8] sm:$0xff] }
  0xcc   : > { %1764 = vmatpush1.bf16.msra.mxu0 %v1763_v48  ;;  %1828 = vmatprep.subr.bf16.mxu1 %v2181_v0 }
  0xce   : > { %848 = vmatmul.mubr.f32.vlgmr.msra.gmra.mrb[0].mxu1 %v402_v49 }
  0xcf   : > { %771 = vmatmul.mubr.f32.vlgmr.msra.gmra.mrb[0].mxu0 %v402_v49  ;;  %1722 = vmatprep.mubr.msk.f32.mxu1 %vm699_vm0, %v405_v1 }
  0xd0   : > { %1720 = vmatprep.mubr.msk.f32.mxu0 %vm699_vm0, %v405_v1 }
  0xd2   : > { %853 = vmatmul.mubr.f32.gmra.mrb[2].mxu1 %v404_v2 }
  0xd3   : > { %777 = vmatmul.mubr.f32.gmra.mrb[2].mxu0 %v404_v2  ;;  %1725 = vmatprep.mubr.msk.f32.mxu1 %vm699_vm0, %v407_v41 }
  0xd4   : > { %1723 = vmatprep.mubr.msk.f32.mxu0 %vm699_vm0, %v407_v41 }
  0xd5   : > { %v866_v50 = vpop.permute.xlu1 %865 }
  0xd6   : > { %v861_v5 = vpop.permute.xlu0 %860 }
  0xd9   : > { %v877_v52 = vpop.permute.xlu1 %876 }
  0xda   : > { %v882_v14 = vpop.permute.xlu0 %881 }
 0x1a1   : > { %v849_v51 = vpop.f32.mrb[0].mxu1 }
 0x1a2   : > { %v870_v53 = vmul.f32 %v861_v5, %v849_v51  ;;  %v772_v54 = vpop.f32.mrb[0].mxu0  ;;  %v851_v55 = vpop.f32.mrb[1].mxu1 }
 0x1a3   : > { %v868_v56 = vmul.f32 %v861_v5, %v772_v54  ;;  %v774_v58 = vpop.f32.mrb[1].mxu0 }
 0x1a4   : > { %v886_v16 = vadd.f32 %v877_v52, %v870_v53  ;;  %v869_v61 = vmul.f32 %v861_v5, %v774_v58 }
 0x1a5   : > { %v884_v62 = vadd.f32 %v877_v52, %v868_v56  ;;  %v854_v4 = vpop.f32.mrb[2].mxu1 }
 0x1a6   : > { %v885_v8 = vadd.f32 %v877_v52, %v869_v61  ;;  %v873_v9 = vmul.f32 %v866_v50, %v854_v4  ;;  %v778_v10 = vpop.f32.mrb[2].mxu0  ;;  %v856_v11 = vpop.f32.mrb[3].mxu1  ;;  %v892_v20 = vmax.f32 %v886_v16, 0.0 }
 0x1a7   : > { %v871_v15 = vmul.f32 %v866_v50, %v778_v10  ;;  %v780_v17 = vpop.f32.mrb[3].mxu0  ;;  %v890_v23 = vmax.f32 %v884_v62, 0.0 }
 0x1a8   : > { %v889_v21 = vadd.f32 %v882_v14, %v873_v9  ;;  %v872_v22 = vmul.f32 %v866_v50, %v780_v17  ;;  %v891_v24 = vmax.f32 %v885_v8, 0.0  ;;  %v2512_v30 = vmul.f32 %v2504_v19, %v892_v20 }
 0x1a9   : > { %v887_v26 = vadd.f32 %v882_v14, %v871_v15  ;;  %v2518_v33 = vmul.f32 %v2499_v13, %v890_v23 }
 0x1aa   : > { %v895_v27 = vmax.f32 %v889_v21, 0.0  ;;  %v888_v28 = vadd.f32 %v882_v14, %v872_v22  ;;  %v2521_v34 = vmul.f32 %v2509_v25, %v891_v24 }
 0x1ab   : > { %v893_v29 = vmax.f32 %v887_v26, 0.0 }
 0x1ac   : > { %v2515_v31 = vmul.f32 %v2504_v19, %v895_v27  ;;  %v894_v32 = vmax.f32 %v888_v28, 0.0 }
 0x1ad   : > { %v2524_v35 = vmul.f32 %v2499_v13, %v893_v29 }
 0x1ae   : > { %v2527_v36 = vmul.f32 %v2509_v25, %v894_v32  ;;  %v2012_v6 = vpack.i.bf16 %v2515_v31, %v2512_v30  ;;  %v1841_v39 = vpack.c.bf16 %v2515_v31, %v2512_v30 }
 0x1af   : > { %v2027_v7 = vpack.i.bf16 %v2524_v35, %v2518_v33  ;;  %v1810_v40 = vpack.c.bf16 %v2524_v35, %v2518_v33 }
 0x1b0   : > { %2013 = vrot.lane.b32.xlu0 %v2012_v6, %s2183_s30  ;;  %2008 = vrot.lane.b32.xlu1 %v2012_v6, %s2182_s29  ;;  %v2037_v37 = vpack.i.bf16 %v2527_v36, %v2521_v34  ;;  %v1808_v38 = vpack.c.bf16 %v2527_v36, %v2521_v34 }
 0x1b4   : > { %2018 = vrot.lane.b32.xlu1 %v2012_v6, %s2184_s12  ;;  %2028 = vrot.lane.b32.xlu0 %v2027_v7, %s2183_s30 }
 0x1b8   : > { %2023 = vrot.lane.b32.xlu1 %v2027_v7, %s2182_s29  ;;  %2038 = vrot.lane.b32.xlu0 %v2037_v37, %s2182_s29 }
 0x1bc   : > { %2033 = vrot.lane.b32.xlu1 %v2027_v7, %s2184_s12  ;;  %2043 = vrot.lane.b32.xlu0 %v2027_v7, %s2185_s13 }
 0x1c0   : > { %2048 = vrot.lane.b32.xlu1 %v2037_v37, %s2183_s30  ;;  %2053 = vrot.lane.b32.xlu0 %v2037_v37, %s2184_s12 }
 0x1c4   : > { %2068 = vrot.lane.b32.xlu1 %v2027_v7, %s2186_s14  ;;  %2058 = vrot.lane.b32.xlu0 %v2012_v6, %s2185_s13 }
 0x1c8   : > { %2073 = vrot.lane.b32.xlu1 %v2037_v37, %s2185_s13  ;;  %2063 = vrot.lane.b32.xlu0 %v2012_v6, %s2186_s14 }
 0x1cc   : > { %2078 = vrot.lane.b32.xlu1 %v2012_v6, %s2187_s15  ;;  %2083 = vrot.lane.b32.xlu0 %v2027_v7, %s2187_s15 }
 0x1d0   : > { %2088 = vrot.lane.b32.xlu1 %v2037_v37, %s2186_s14  ;;  %2093 = vrot.lane.b32.xlu0 %v2037_v37, %s2187_s15 }
 0x1d4   : > { %2103 = vrot.lane.b32.xlu1 %v2027_v7, %s2188_s16  ;;  %2098 = vrot.lane.b32.xlu0 %v2012_v6, %s2188_s16 }
 0x1d8   : > { %2108 = vrot.lane.b32.xlu1 %v2037_v37, %s2188_s16  ;;  %2118 = vrot.lane.b32.xlu0 %v2037_v37, %s2189_s21 }
 0x1dc   : > { %2113 = vrot.lane.b32.xlu1 %v2012_v6, %s2189_s21  ;;  %2123 = vrot.lane.b32.xlu0 %v2027_v7, %s2189_s21 }
 0x1e0   : > { %1330 = vperm.xlu1 %2006, %v414_v42   ;;  %1335 = vperm.xlu0 %2005, %v415_v43  }
 0x1e4   : > { %1346 = vperm.xlu1 %2006, %v416_v44   ;;  %1351 = vperm.xlu0 %2005, %v417_v45  }
 0x222   : > { %v2014_v46 = vpop.permute.xlu0 %2013  ;;  %v2009_v47 = vpop.permute.xlu1 %2008 }
 0x223   : > { %v2011_v1 = vunpack.i.h.bf16 %v2009_v47  ;;  %v2010_v2 = vunpack.i.l.bf16 %v2009_v47  ;;  %v2016_v15 = vunpack.i.h.bf16 %v2014_v46  ;;  %v2015_v17 = vunpack.i.l.bf16 %v2014_v46 }
 0x226   : > { %v2019_v48 = vpop.permute.xlu1 %2018  ;;  %v2029_v49 = vpop.permute.xlu0 %2028 }
 0x227   : > { %v2031_v11 = vunpack.i.h.bf16 %v2029_v49  ;;  %v2030_v20 = vunpack.i.l.bf16 %v2029_v49  ;;  %v2021_v28 = vunpack.i.h.bf16 %v2019_v48  ;;  %v2020_v29 = vunpack.i.l.bf16 %v2019_v48 }
 0x229   : > { %v959_v32 = vsel %vm476_vm2, %v2016_v15, %v2031_v11  ;;  %v958_v42 = vsel %vm476_vm2, %v2015_v17, %v2030_v20 }
 0x22a   : > { %v2024_v50 = vpop.permute.xlu1 %2023  ;;  %v2039_v5 = vpop.permute.xlu0 %2038 }
 0x22b   : > { %v2026_v51 = vunpack.i.h.bf16 %v2024_v50  ;;  %v2025_v52 = vunpack.i.l.bf16 %v2024_v50  ;;  %v2041_v53 = vunpack.i.h.bf16 %v2039_v5  ;;  %v2040_v54 = vunpack.i.l.bf16 %v2039_v5 }
 0x22d   : > { %v935_v55 = vsel %vm451_vm1, %v2011_v1, %v2026_v51  ;;  %v934_v56 = vsel %vm451_vm1, %v2010_v2, %v2025_v52  ;;  %v931_v58 = vsel %vm451_vm1, %v2041_v53, %v2011_v1  ;;  %v930_v16 = vsel %vm451_vm1, %v2040_v54, %v2010_v2 }
 0x22e   : > { %v1829_v61 = vpack.c.bf16 %v931_v58, %v930_v16  ;;  %v2034_v62 = vpop.permute.xlu1 %2033  ;;  %v2590_v4 = vpop.permute.xlu0 %2043  ;;  %v932_v8 = vsel %vm451_vm1, %v2025_v52, %v2040_v54  ;;  %v933_v9 = vsel %vm451_vm1, %v2026_v51, %v2041_v53  ;;  %v1794_v10 = vpack.c.bf16 %v935_v55, %v934_v56 }
 0x22f   : > { %v1792_v14 = vpack.c.bf16 %v933_v9, %v932_v8  ;;  %v2036_v6 = vunpack.i.h.bf16 %v2034_v62  ;;  %v2035_v7 = vunpack.i.l.bf16 %v2034_v62  ;;  %v1798_v51 = vpack.c.bf16 %v959_v32, %v958_v42 }
 0x230   : > { %1830 = vmatpush1.bf16.msra.mxu1 %v1829_v61  ;;  %v2045_v55 = vunpack.i.l.bf16 %v2590_v4  ;;  %v2046_v62 = vunpack.i.h.bf16 %v2590_v4 }
 0x231   : > { %1831 = vmatprep.subr.bf16.mxu1 %v2181_v0  ;;  %1793 = vmatprep.subr.bf16.mxu0 %v1792_v14  ;;  %v983_v52 = vsel %vm501_vm3, %v2021_v28, %v2036_v6  ;;  %v982_v53 = vsel %vm501_vm3, %v2020_v29, %v2035_v7 }
 0x232   : > { %v2049_v21 = vpop.permute.xlu1 %2048  ;;  %v2054_v22 = vpop.permute.xlu0 %2053  ;;  %1795 = vmatpush1.bf16.msra.mxu0 %v1794_v10  ;;  %v1802_v10 = vpack.c.bf16 %v983_v52, %v982_v53 }
 0x233   : > { %v2051_v23 = vunpack.i.h.bf16 %v2049_v21  ;;  %v2050_v24 = vunpack.i.l.bf16 %v2049_v21  ;;  %v2056_v26 = vunpack.i.h.bf16 %v2054_v22  ;;  %v2055_v27 = vunpack.i.l.bf16 %v2054_v22 }
 0x235   : > { %v955_v37 = vsel %vm476_vm2, %v2051_v23, %v2016_v15  ;;  %v954_v41 = vsel %vm476_vm2, %v2050_v24, %v2015_v17  ;;  %v956_v46 = vsel %vm476_vm2, %v2030_v20, %v2050_v24  ;;  %v957_v47 = vsel %vm476_vm2, %v2031_v11, %v2051_v23 }
 0x236   : > { %v1832_v43 = vpack.c.bf16 %v955_v37, %v954_v41  ;;  %v2605_v44 = vpop.permute.xlu1 %2068  ;;  %v2059_v45 = vpop.permute.xlu0 %2058  ;;  %v979_v48 = vsel %vm501_vm3, %v2056_v26, %v2021_v28  ;;  %v978_v49 = vsel %vm501_vm3, %v2055_v27, %v2020_v29  ;;  %v1796_v2 = vpack.c.bf16 %v957_v47, %v956_v46 }
 0x237   : > { %v2060_v1 = vunpack.i.l.bf16 %v2059_v45  ;;  %v980_v50 = vsel %vm501_vm3, %v2035_v7, %v2055_v27  ;;  %v981_v5 = vsel %vm501_vm3, %v2036_v6, %v2056_v26  ;;  %v2061_v54 = vunpack.i.h.bf16 %v2059_v45 }
 0x238   : > { %1833 = vmatpush1.bf16.msra.mxu1 %v1832_v43  ;;  %v1835_v56 = vpack.c.bf16 %v979_v48, %v978_v49  ;;  %1797 = vmatprep.subr.bf16.mxu0 %v1796_v2  ;;  %v1800_v61 = vpack.c.bf16 %v981_v5, %v980_v50  ;;  %v2071_v27 = vunpack.i.h.bf16 %v2605_v44  ;;  %v2070_v28 = vunpack.i.l.bf16 %v2605_v44 }
 0x239   : > { %1834 = vmatprep.subr.bf16.mxu1 %v2181_v0  ;;  %1799 = vmatpush1.bf16.msra.mxu0 %v1798_v51  ;;  %v1006_v11 = vsel %vm526_vm4, %v2060_v1, %v2045_v55  ;;  %v1007_v14 = vsel %vm526_vm4, %v2061_v54, %v2046_v62 }
 0x23a   : > { %v2074_v58 = vpop.permute.xlu1 %2073  ;;  %v2064_v16 = vpop.permute.xlu0 %2063  ;;  %1801 = vmatprep.subr.bf16.mxu0 %v1800_v61  ;;  %v1806_v32 = vpack.c.bf16 %v1007_v14, %v1006_v11 }
 0x23b   : > { %v2076_v8 = vunpack.i.h.bf16 %v2074_v58  ;;  %v2075_v9 = vunpack.i.l.bf16 %v2074_v58  ;;  %v2066_v20 = vunpack.i.h.bf16 %v2064_v16  ;;  %v2065_v21 = vunpack.i.l.bf16 %v2064_v16 }
 0x23c   : > { %1836 = vmatpush1.bf16.msra.mxu1 %v1835_v56 }
 0x23d   : > { %v1002_v15 = vsel %vm526_vm4, %v2075_v9, %v2060_v1  ;;  %v1003_v17 = vsel %vm526_vm4, %v2076_v8, %v2061_v54  ;;  %1837 = vmatprep.subr.bf16.mxu1 %v2181_v0  ;;  %v1004_v24 = vsel %vm526_vm4, %v2045_v55, %v2075_v9  ;;  %v1005_v26 = vsel %vm526_vm4, %v2046_v62, %v2076_v8 }
 0x23e   : > { %v1838_v4 = vpack.c.bf16 %v1003_v17, %v1002_v15  ;;  %v2079_v22 = vpop.permute.xlu1 %2078  ;;  %v2084_v23 = vpop.permute.xlu0 %2083  ;;  %1803 = vmatpush1.bf16.msra.mxu0 %v1802_v10  ;;  %v1804_v29 = vpack.c.bf16 %v1005_v26, %v1004_v24  ;;  %v1037_v37 = vsel %vm557_vm5, %v2066_v20, %v2071_v27  ;;  %v1036_v41 = vsel %vm557_vm5, %v2065_v21, %v2070_v28 }
 0x23f   : > { %v2081_v6 = vunpack.i.h.bf16 %v2079_v22  ;;  %v2086_v7 = vunpack.i.h.bf16 %v2084_v23  ;;  %v2080_v42 = vunpack.i.l.bf16 %v2079_v22  ;;  %v2085_v43 = vunpack.i.l.bf16 %v2084_v23 }
 0x240   : > { %1839 = vmatpush1.bf16.msra.mxu1 %v1838_v4  ;;  %1805 = vmatprep.subr.bf16.mxu0 %v1804_v29  ;;  %v1844_v1 = vpack.c.bf16 %v1037_v37, %v1036_v41 }
 0x241   : > { %1840 = vmatprep.subr.bf16.mxu1 %v2181_v0  ;;  %v1061_v2 = vsel %vm582_vm6, %v2081_v6, %v2086_v7  ;;  %v1060_v34 = vsel %vm582_vm6, %v2080_v42, %v2085_v43 }
 0x242   : > { %v2089_v45 = vpop.permute.xlu1 %2088  ;;  %v2094_v46 = vpop.permute.xlu0 %2093  ;;  %1807 = vmatpush1.bf16.msra.mxu0 %v1806_v32 }
 0x243   : > { %v2091_v44 = vunpack.i.h.bf16 %v2089_v45  ;;  %v2090_v47 = vunpack.i.l.bf16 %v2089_v45  ;;  %v2096_v48 = vunpack.i.h.bf16 %v2094_v46  ;;  %v2095_v49 = vunpack.i.l.bf16 %v2094_v46  ;;  %1809 = vmatprep.subr.bf16.mxu0 %v1808_v38 }
 0x244   : > { %1842 = vmatpush1.bf16.msra.mxu1 %v1841_v39 }
 0x245   : > { %v1034_v50 = vsel %vm557_vm5, %v2070_v28, %v2090_v47  ;;  %v1035_v5 = vsel %vm557_vm5, %v2071_v27, %v2091_v44  ;;  %1843 = vmatprep.subr.bf16.mxu1 %v2181_v0  ;;  %v1032_v30 = vsel %vm557_vm5, %v2090_v47, %v2065_v21  ;;  %v1033_v31 = vsel %vm557_vm5, %v2091_v44, %v2066_v20 }
 0x246   : > { %v1814_v36 = vpack.c.bf16 %v1035_v5, %v1034_v50  ;;  %v2104_v38 = vpop.permute.xlu1 %2103  ;;  %v2099_v51 = vpop.permute.xlu0 %2098  ;;  %1811 = vmatpush1.bf16.msra.mxu0 %v1810_v40  ;;  %v1812_v55 = vpack.c.bf16 %v1033_v31, %v1032_v30  ;;  %v1056_v56 = vsel %vm582_vm6, %v2095_v49, %v2080_v42  ;;  %v1057_v58 = vsel %vm582_vm6, %v2096_v48, %v2081_v6 }
 0x247   : > { %v2106_v39 = vunpack.i.h.bf16 %v2104_v38  ;;  %v2105_v52 = vunpack.i.l.bf16 %v2104_v38  ;;  %v2101_v53 = vunpack.i.h.bf16 %v2099_v51  ;;  %v2100_v54 = vunpack.i.l.bf16 %v2099_v51 }
 0x248   : > { %1845 = vmatpush1.bf16.msra.mxu1 %v1844_v1  ;;  %v1058_v16 = vsel %vm582_vm6, %v2085_v43, %v2095_v49  ;;  %v1059_v61 = vsel %vm582_vm6, %v2086_v7, %v2096_v48  ;;  %v1847_v40 = vpack.c.bf16 %v1061_v2, %v1060_v34  ;;  %1813 = vmatprep.subr.bf16.mxu0 %v1812_v55  ;;  %v406_v49 = vld [vmem:[%s2927_s5] sm:$0xff]  ;;  %v408_v1 = vld [vmem:[%s2927_s5 + $0x10] sm:$0xff]  ;;  %v1361_v2 = vsel %vm1360_vm9, 1, %v2190_v12 }
 0x249   : > { %v1085_v33 = vsel %vm607_vm7, %v2101_v53, %v2106_v39  ;;  %v1084_v35 = vsel %vm607_vm7, %v2100_v54, %v2105_v52  ;;  %1846 = vmatprep.subr.bf16.mxu1 %v2181_v0  ;;  %v1816_v9 = vpack.c.bf16 %v1057_v58, %v1056_v56  ;;  %v1818_v14 = vpack.c.bf16 %v1059_v61, %v1058_v16 }
 0x24a   : > { %v2109_v62 = vpop.permute.xlu1 %2108  ;;  %v2119_v8 = vpop.permute.xlu0 %2118  ;;  %1815 = vmatpush1.bf16.msra.mxu0 %v1814_v36  ;;  %v1850_v15 = vpack.c.bf16 %v1085_v33, %v1084_v35  ;;  %v1373_v5 = vrot.slane %v1361_v2, %v907_v60  ;;  %v1365_v30 = vrot.slane %v1361_v2, %v2488_v57 }
 0x24b   : > { %v2111_v10 = vunpack.i.h.bf16 %v2109_v62  ;;  %v2110_v11 = vunpack.i.l.bf16 %v2109_v62  ;;  %1817 = vmatprep.subr.bf16.mxu0 %v1816_v9  ;;  %v2121_v23 = vunpack.i.h.bf16 %v2119_v8  ;;  %v2120_v24 = vunpack.i.l.bf16 %v2119_v8 }
 0x24c   : > { %1848 = vmatpush1.bf16.msra.mxu1 %v1847_v40  ;;  %vm1376_vm10 = vcmp.eq.s32.totalorder %v1373_v5, 1  ;;  %vm2723_vm11 = vcmp.eq.s32.totalorder %v1365_v30, 1 }
 0x24d   : > { %v1082_v17 = vsel %vm607_vm7, %v2105_v52, %v2110_v11  ;;  %v1083_v20 = vsel %vm607_vm7, %v2106_v39, %v2111_v10  ;;  %1849 = vmatprep.subr.bf16.mxu1 %v2181_v0  ;;  %v1080_v4 = vsel %vm607_vm7, %v2110_v11, %v2100_v54  ;;  %v1081_v21 = vsel %vm607_vm7, %v2111_v10, %v2101_v53 }
 0x24e   : > { %v1822_v22 = vpack.c.bf16 %v1083_v20, %v1082_v17  ;;  %v2114_v26 = vpop.permute.xlu1 %2113  ;;  %v2124_v27 = vpop.permute.xlu0 %2123  ;;  %v1820_v28 = vpack.c.bf16 %v1081_v21, %v1080_v4  ;;  %1819 = vmatpush1.bf16.msra.mxu0 %v1818_v14  ;;  %v1369_v39 = vrot.slane %v1361_v2, %v903_v63 }
 0x24f   : > { %v2116_v29 = vunpack.i.h.bf16 %v2114_v26  ;;  %v2115_v32 = vunpack.i.l.bf16 %v2114_v26  ;;  %v2126_v6 = vunpack.i.h.bf16 %v2124_v27  ;;  %v2125_v7 = vunpack.i.l.bf16 %v2124_v27  ;;  %v419_v27 = vld [vmem:[%s2930_s8 + $0x8] sm:$0xff] }
 0x250   : > { %1821 = vmatprep.subr.bf16.mxu0 %v1820_v28  ;;  %1851 = vmatpush1.bf16.msra.mxu1 %v1850_v15  ;;  %vm1375_vm12 = vcmp.eq.s32.totalorder %v1369_v39, 1 }
 0x251   : > { %v1109_v37 = vsel %vm632_vm8, %v2116_v29, %v2126_v6  ;;  %v1106_v41 = vsel %vm632_vm8, %v2125_v7, %v2120_v24  ;;  %v1107_v42 = vsel %vm632_vm8, %v2126_v6, %v2121_v23  ;;  %v1108_v43 = vsel %vm632_vm8, %v2115_v32, %v2125_v7  ;;  %1852 = vmatprep.subr.bf16.mxu1 %v2181_v0  ;;  %v409_v0 = vld [vmem:[%s2927_s5 + $0x18] sm:$0xff] }
 0x252   : > { %v1853_v45 = vpack.c.bf16 %v1109_v37, %v1108_v43  ;;  %v1104_v46 = vsel %vm632_vm8, %v2120_v24, %v2115_v32  ;;  %v1105_v44 = vsel %vm632_vm8, %v2121_v23, %v2116_v29  ;;  %v1826_v47 = vpack.c.bf16 %v1107_v42, %v1106_v41  ;;  %1823 = vmatpush1.bf16.msra.mxu0 %v1822_v22  ;;  %v418_v24 = vld [vmem:[%s2930_s8] sm:$0xff] }
 0x253   : > { %v1824_v48 = vpack.c.bf16 %v1105_v44, %v1104_v46 }
 0x254   : > { %1854 = vmatpush1.bf16.msra.mxu1 %v1853_v45 }
 0x255   : > { %1825 = vmatprep.subr.bf16.mxu0 %v1824_v48  ;;  %v420_v48 = vld [vmem:[%s2931_s9] sm:$0xff] }
 0x256   : > { %1827 = vmatpush1.bf16.msra.mxu0 %v1826_v47  ;;  %v421_v47 = vld [vmem:[%s2931_s9 + $0x8] sm:$0xff] }
 0x257   : > { %1318 = vmatmul.mubr.f32.vlgmr.msra.gmra.mrb[4].mxu1 %v406_v49 }
 0x258   : > { %1726 = vmatprep.mubr.msk.f32.mxu1 %vm699_vm0, %v409_v0 }
 0x259   : > { %1241 = vmatmul.mubr.f32.vlgmr.msra.gmra.mrb[4].mxu0 %v406_v49 }
 0x25a   : > { %1724 = vmatprep.mubr.msk.f32.mxu0 %vm699_vm0, %v409_v0 }
 0x25b   : > { %1323 = vmatmul.mubr.f32.gmra.mrb[6].mxu1 %v408_v1 }
 0x25d   : > { %1247 = vmatmul.mubr.f32.gmra.mrb[6].mxu0 %v408_v1 }
 0x25f   : > { %v1331_v50 = vpop.permute.xlu1 %1330  ;;  %v1336_v34 = vpop.permute.xlu0 %1335 }
 0x263   : > { %v1347_v31 = vpop.permute.xlu1 %1346  ;;  %v1352_v16 = vpop.permute.xlu0 %1351 }
 0x32a   : > { %v1319_v36 = vpop.f32.mrb[4].mxu1 }
 0x32b   : > { %v1340_v38 = vmul.f32 %v1331_v50, %v1319_v36  ;;  %v1321_v51 = vpop.f32.mrb[5].mxu1 }
 0x32c   : > { %v1242_v53 = vpop.f32.mrb[4].mxu0 }
 0x32d   : > { %v2721_v52 = vadd.f32 %v1347_v31, %v1340_v38  ;;  %v1338_v59 = vmul.f32 %v1331_v50, %v1242_v53  ;;  %v1244_v12 = vpop.f32.mrb[5].mxu0 }
 0x32e   : > { %v1324_v54 = vpop.f32.mrb[6].mxu1  ;;  %v1339_v55 = vmul.f32 %v1331_v50, %v1244_v12 }
 0x32f   : > { %v1343_v56 = vmul.f32 %v1336_v34, %v1324_v54  ;;  %v1326_v60 = vpop.f32.mrb[7].mxu1  ;;  %v2727_v61 = vadd.f32 %v1347_v31, %v1338_v59  ;;  %v1379_v3 = vsel %vm1376_vm10, %v2721_v52, -1e+30 }
 0x330   : > { %v2731_v63 = vadd.f32 %v1347_v31, %v1339_v55  ;;  %v1248_v35 = vpop.f32.mrb[6].mxu0 }
 0x331   : > { %v1359_v33 = vadd.f32 %v1352_v16, %v1343_v56  ;;  %v1341_v40 = vmul.f32 %v1336_v34, %v1248_v35  ;;  %v1250_v62 = vpop.f32.mrb[7].mxu0  ;;  %v1377_v8 = vsel %vm2723_vm11, %v2727_v61, -1e+30 }
 0x332   : > { %v1342_v9 = vmul.f32 %v1336_v34, %v1250_v62  ;;  %v1378_v10 = vsel %vm1375_vm12, %v2731_v63, -1e+30  ;;  %v1383_v11 = vmax.f32 %v1377_v8, %v1379_v3 }
 0x333   : > { %v1357_v14 = vadd.f32 %v1352_v16, %v1341_v40  ;;  %v1382_v15 = vsel %vm1376_vm10, %v1359_v33, -1e+30 }
 0x334   : > { %v1358_v17 = vadd.f32 %v1352_v16, %v1342_v9  ;;  %v1384_v20 = vmax.f32 %v1383_v11, %v1378_v10 }
 0x335   : > { %v1380_v4 = vsel %vm2723_vm11, %v1357_v14, -1e+30 }
 0x336   : > { %1385 = vmax.xlane.f32.xlu1 %v1384_v20  ;;  %v1381_v21 = vsel %vm1375_vm12, %v1358_v17, -1e+30  ;;  %v1387_v22 = vmax.f32 %v1380_v4, %v1382_v15 }
 0x338   : > { %v1388_v23 = vmax.f32 %v1387_v22, %v1381_v21 }
 0x33a   : > { %1389 = vmax.xlane.f32.xlu0 %v1388_v23 }
 0x3c3   : > { %v1386_v26 = vpop.xlane.xlu1 %1385 }
 0x3c4   : > { %v1391_v28 = vmul.f32 %v1386_v26, %v418_v24 }
 0x3c6   : > { %v1394_v6 = vsel %vm1393_vm13, %v1391_v28, 0.0 }
 0x3c7   : > { %v1390_v29 = vpop.xlane.xlu0 %1389 }
 0x3c8   : > { %v1392_v32 = vmul.f32 %v1390_v29, %v419_v27 }
 0x3ca   : > { %v1395_v7 = vsel %vm1393_vm13, %v1392_v32, 0.0 }
 0x3cb   : > { %v1396_v37 = vadd.f32 %v1395_v7, %v1394_v6 }
 0x3cd   : > { %v1397_v41 = vrot.slane %v1396_v37, 4 }
 0x3cf   : > { %v1398_v42 = vadd.f32 %v1397_v41, %v1396_v37 }
 0x3d1   : > { %v1399_v43 = vrot.slane %v1398_v42, 2 }
 0x3d3   : > { %v1400_v45 = vadd.f32 %v1399_v43, %v1398_v42 }
 0x3d5   : > { %v1401_v46 = vrot.slane %v1400_v45, 1 }
 0x3d7   : > { %v1402_v44 = vadd.f32 %v1401_v46, %v1400_v45 }
 0x3d9   : > { %v1403_v49 = vmax.f32 %v1402_v44, 0.0 }
 0x3db   : > { %v1405_v0 = vmul.f32 %v1403_v49, %v421_v47  ;;  %v1404_v1 = vmul.f32 %v1403_v49, %v420_v48 }
 0x3dd   : > { %v1409_v2 = vsel %vm1393_vm13, %v1405_v0, 0.0  ;;  %v1406_v50 = vsel %vm1393_vm13, %v1404_v1, 0.0 }
 0x3de   : > { %1410 = vadd.xlane.f32.xlu1 %v1409_v2  ;;  %1407 = vadd.xlane.f32.xlu0 %v1406_v50 }
 0x46b   : > { %v1411_v5 = vpop.xlane.xlu1 %1410  ;;  %v1408_v34 = vpop.xlane.xlu0 %1407 }
 0x46c   : > { %v1413_v36 = vsub.f32 0.0, %v1411_v5  ;;  %v1412_v38 = vsub.f32 0.0, %v1408_v34 }
 0x46e   : > { %v1416_v51 = vmul.f32 1.442695, %v1413_v36  ;;  %v1414_v30 = vmul.f32 1.442695, %v1412_v38 }
 0x470   : > { %2127 = vpow2.f32 %v1416_v51 }
 0x471   : > { %2129 = vpow2.f32 %v1414_v30 }
 0x47a   : > { %v2128_v31 = vpop.eup %2127 }
 0x47b   : > { %v2130_v39 = vpop.eup %2129  ;;  %v1419_v53 = vadd.f32 1.0, %v2128_v31 }
 0x47c   : > { %v1418_v59 = vadd.f32 1.0, %v2130_v39 }
 0x47d   : > { %2131 = vrcp.f32 %v1419_v53 }
 0x47e   : > { %2133 = vrcp.f32 %v1418_v59 }
 0x487   : > { %v2132_v12 = vpop.eup %2131 }
 0x488   : > { %v2134_v54 = vpop.eup %2133  ;;  %v2758_v55 = vmul.f32 %v2132_v12, %v1357_v14  ;;  %v2760_v56 = vmul.f32 %v2132_v12, %v1358_v17  ;;  %v2762_v60 = vmul.f32 %v2132_v12, %v1359_v33 }
 0x489   : > { %v2765_v58 = vmul.f32 %v2134_v54, %v2727_v61  ;;  %v2768_v16 = vmul.f32 %v2134_v54, %v2731_v63  ;;  %v2771_v3 = vmul.f32 %v2134_v54, %v2721_v52 }
 0x48b   : > { %v1428_v35 = vmax.f32 %v2765_v58, %v2758_v55  ;;  %v1435_v40 = vmax.f32 %v2768_v16, %v2760_v56  ;;  %v1442_v62 = vmax.f32 %v2771_v3, %v2762_v60 }
 0x48d   : > { %v1429_v33 = vrot.slane %v1428_v35, 4  ;;  %v1436_v8 = vrot.slane %v1435_v40, 4  ;;  %v1443_v9 = vrot.slane %v1442_v62, 4 }
 0x48f   : > { %v1430_v61 = vmax.f32 %v1428_v35, %v1429_v33  ;;  %v1437_v10 = vmax.f32 %v1435_v40, %v1436_v8  ;;  %v1444_v11 = vmax.f32 %v1442_v62, %v1443_v9 }
 0x491   : > { %v1431_v63 = vrot.slane %v1430_v61, 2  ;;  %v1438_v14 = vrot.slane %v1437_v10, 2  ;;  %v1445_v15 = vrot.slane %v1444_v11, 2 }
 0x493   : > { %v1432_v52 = vmax.f32 %v1430_v61, %v1431_v63  ;;  %v1439_v17 = vmax.f32 %v1437_v10, %v1438_v14  ;;  %v1446_v20 = vmax.f32 %v1444_v11, %v1445_v15 }
 0x495   : > { %v1433_v4 = vrot.slane %v1432_v52, 1  ;;  %v1440_v21 = vrot.slane %v1439_v17, 1  ;;  %v1447_v22 = vrot.slane %v1446_v20, 1 }
 0x497   : > { %v1434_v23 = vmax.f32 %v1432_v52, %v1433_v4  ;;  %v1441_v24 = vmax.f32 %v1439_v17, %v1440_v21  ;;  %v1448_v26 = vmax.f32 %v1446_v20, %v1447_v22 }
 0x499   : > { %v2780_v27 = vmul.f32 %v1434_v23, %v2499_v13  ;;  %v2783_v28 = vmul.f32 %v1441_v24, %v2509_v25  ;;  %v2790_v29 = vmul.f32 %v1448_v26, %v2504_v19 }
 0x49b   : > { %1454 = vrot.lane.b32.xlu1 %v2783_v28, %s2182_s29  ;;  %1452 = vrot.lane.b32.xlu0 %v2780_v27, %s2182_s29 }
 0x49f   : > { %1456 = vrot.lane.b32.xlu1 %v2790_v29, %s2182_s29  ;;  %1465 = vrot.lane.b32.xlu0 %v2780_v27, %s2183_s30  ;;  %s1711_s29 = sld [smem:[#allocation3 + $0x1]] }
 0x4a3   : > { %1467 = vrot.lane.b32.xlu1 %v2783_v28, %s2183_s30  ;;  %1469 = vrot.lane.b32.xlu0 %v2790_v29, %s2183_s30  ;;  %s422_s30 = sld [smem:[#allocation3]] }
 0x4a5   : > { %v1474_v44 = vstv %s1711_s29 }
 0x4a7   : > { %1481 = vrot.lane.b32.xlu1 %v2780_v27, %s2184_s12  ;;  %1483 = vrot.lane.b32.xlu0 %v2783_v28, %s2184_s12 }
 0x4a9   : > { %v1461_v0 = vstv %s422_s30 }
 0x4ab   : > { %1485 = vrot.lane.b32.xlu1 %v2790_v29, %s2184_s12  ;;  %1497 = vrot.lane.b32.xlu0 %v2780_v27, %s2185_s13  ;;  %s1712_s12 = sld [smem:[#allocation3 + $0x2]] }
 0x4af   : > { %1499 = vrot.lane.b32.xlu1 %v2783_v28, %s2185_s13  ;;  %1501 = vrot.lane.b32.xlu0 %v2790_v29, %s2185_s13  ;;  %s1713_s13 = sld [smem:[#allocation3 + $0x3]] }
 0x4b1   : > { %v1490_v36 = vstv %s1712_s12 }
 0x4b3   : > { %1520 = vrot.lane.b32.xlu1 %v2780_v27, %s2186_s14  ;;  %1522 = vrot.lane.b32.xlu0 %v2783_v28, %s2186_s14 }
 0x4b5   : > { %v1506_v38 = vstv %s1713_s13 }
 0x4b7   : > { %1524 = vrot.lane.b32.xlu1 %v2790_v29, %s2186_s14  ;;  %1536 = vrot.lane.b32.xlu0 %v2780_v27, %s2187_s15  ;;  %s2842_s14 = sld [smem:[#allocation3 + $0x4]] }
 0x4bb   : > { %1538 = vrot.lane.b32.xlu1 %v2783_v28, %s2187_s15  ;;  %1540 = vrot.lane.b32.xlu0 %v2790_v29, %s2187_s15  ;;  %s2850_s15 = sld [smem:[#allocation3 + $0x5]] }
 0x4bd   : > { %v1513_v20 = vstv %s2842_s14 }
 0x4bf   : > { %1552 = vrot.lane.b32.xlu1 %v2780_v27, %s2188_s16  ;;  %1554 = vrot.lane.b32.xlu0 %v2783_v28, %s2188_s16 }
 0x4c3   : > { %1556 = vrot.lane.b32.xlu1 %v2790_v29, %s2188_s16  ;;  %1568 = vrot.lane.b32.xlu0 %v2780_v27, %s2189_s21  ;;  %s2860_s16 = sld [smem:[#allocation3 + $0x6]] }
 0x4c7   : > { %1570 = vrot.lane.b32.xlu1 %v2783_v28, %s2189_s21  ;;  %1572 = vrot.lane.b32.xlu0 %v2790_v29, %s2189_s21  ;;  %s2866_s21 = sld [smem:[#allocation3 + $0x7]] }
 0x50d   : > { %v1455_v13 = vpop.permute.xlu1 %1454  ;;  %v1453_v19 = vpop.permute.xlu0 %1452 }
 0x50e   : > { %v1459_v30 = vsel %vm451_vm1, %v1453_v19, %v1455_v13 }
 0x50f   : > { %v1463_v61 = vmul.f32 %v1461_v0, %v1459_v30 }
 0x511   : > { %v1457_v25 = vpop.permute.xlu1 %1456  ;;  %v1466_v32 = vpop.permute.xlu0 %1465 }
 0x512   : > { %v1460_v48 = vsel %vm451_vm1, %v1457_v25, %v1453_v19  ;;  %v1458_v59 = vsel %vm451_vm1, %v1455_v13, %v1457_v25  ;;  %v1529_v13 = vstv %s2850_s15 }
 0x513   : > { %v1462_v31 = vmul.f32 %v1461_v0, %v1460_v48  ;;  %v1464_v63 = vmul.f32 %v1461_v0, %v1458_v59  ;;  %v1561_v0 = vstv %s2866_s21 }
 0x515   : > { %v1468_v6 = vpop.permute.xlu1 %1467  ;;  %v1470_v7 = vpop.permute.xlu0 %1469 }
 0x516   : > { %v1473_v47 = vsel %vm476_vm2, %v1470_v7, %v1466_v32  ;;  %v1472_v1 = vsel %vm476_vm2, %v1466_v32, %v1468_v6  ;;  %v1471_v34 = vsel %vm476_vm2, %v1468_v6, %v1470_v7  ;;  %v1514_v32 = vmul.f32 %v1513_v20, %v2780_v27 }
 0x517   : > { %v1475_v2 = vmul.f32 %v1474_v44, %v1473_v47  ;;  %v1476_v12 = vmul.f32 %v1474_v44, %v1472_v1  ;;  %v1477_v35 = vmul.f32 %v1474_v44, %v1471_v34  ;;  %v1515_v6 = vmul.f32 %v1513_v20, %v2783_v28 }
 0x519   : > { %v1482_v37 = vpop.permute.xlu1 %1481  ;;  %v1484_v41 = vpop.permute.xlu0 %1483  ;;  %v1478_v40 = vadd.f32 %v1475_v2, %v1462_v31  ;;  %v1479_v52 = vadd.f32 %v1476_v12, %v1463_v61  ;;  %v1480_v4 = vadd.f32 %v1477_v35, %v1464_v63  ;;  %v1516_v2 = vmul.f32 %v1513_v20, %v2790_v29 }
 0x51a   : > { %v1488_v39 = vsel %vm501_vm3, %v1482_v37, %v1484_v41 }
 0x51b   : > { %v1492_v10 = vmul.f32 %v1490_v36, %v1488_v39 }
 0x51d   : > { %v1486_v42 = vpop.permute.xlu1 %1485  ;;  %v1498_v43 = vpop.permute.xlu0 %1497  ;;  %v1495_v26 = vadd.f32 %v1492_v10, %v1479_v52 }
 0x51e   : > { %v1489_v49 = vsel %vm501_vm3, %v1486_v42, %v1482_v37  ;;  %v1487_v54 = vsel %vm501_vm3, %v1484_v41, %v1486_v42  ;;  %v1545_v42 = vstv %s2860_s16 }
 0x51f   : > { %v1491_v53 = vmul.f32 %v1490_v36, %v1489_v49  ;;  %v1493_v14 = vmul.f32 %v1490_v36, %v1487_v54 }
 0x521   : > { %v1500_v45 = vpop.permute.xlu1 %1499  ;;  %v1502_v46 = vpop.permute.xlu0 %1501  ;;  %v1494_v15 = vadd.f32 %v1491_v53, %v1478_v40  ;;  %v1496_v25 = vadd.f32 %v1493_v14, %v1480_v4 }
 0x522   : > { %v1505_v51 = vsel %vm526_vm4, %v1502_v46, %v1498_v43  ;;  %v1504_v62 = vsel %vm526_vm4, %v1498_v43, %v1500_v45  ;;  %v1503_v11 = vsel %vm526_vm4, %v1500_v45, %v1502_v46 }
 0x523   : > { %v1507_v33 = vmul.f32 %v1506_v38, %v1505_v51  ;;  %v1508_v17 = vmul.f32 %v1506_v38, %v1504_v62  ;;  %v1509_v21 = vmul.f32 %v1506_v38, %v1503_v11 }
 0x525   : > { %v1521_v50 = vpop.permute.xlu1 %1520  ;;  %v1523_v5 = vpop.permute.xlu0 %1522  ;;  %v1510_v22 = vadd.f32 %v1507_v33, %v1494_v15  ;;  %v1511_v37 = vadd.f32 %v1508_v17, %v1495_v26  ;;  %v1512_v45 = vadd.f32 %v1509_v21, %v1496_v25 }
 0x526   : > { %v1527_v19 = vsel %vm557_vm5, %v1521_v50, %v1523_v5 }
 0x527   : > { %v1517_v46 = vadd.f32 %v1514_v32, %v1510_v22  ;;  %v1530_v44 = vmul.f32 %v1529_v13, %v1527_v19  ;;  %v1518_v34 = vadd.f32 %v1515_v6, %v1511_v37  ;;  %v1519_v51 = vadd.f32 %v1516_v2, %v1512_v45  ;;  %v2147_v2 = vld [vmem:[%s2281_s28] sm:$0xff] }
 0x529   : > { %v1525_v8 = vpop.permute.xlu1 %1524  ;;  %v1537_v9 = vpop.permute.xlu0 %1536  ;;  %v1533_v38 = vadd.f32 %v1530_v44, %v1517_v46 }
 0x52a   : > { %v1526_v7 = vsel %vm557_vm5, %v1523_v5, %v1525_v8  ;;  %v1528_v41 = vsel %vm557_vm5, %v1525_v8, %v1521_v50  ;;  %v1577_v8 = vstv %s1718_s25 }
 0x52b   : > { %v1531_v48 = vmul.f32 %v1529_v13, %v1526_v7  ;;  %v1532_v50 = vmul.f32 %v1529_v13, %v1528_v41 }
 0x52d   : > { %v1539_v23 = vpop.permute.xlu1 %1538  ;;  %v1541_v24 = vpop.permute.xlu0 %1540  ;;  %v1534_v59 = vadd.f32 %v1531_v48, %v1518_v34  ;;  %v1535_v35 = vadd.f32 %v1532_v50, %v1519_v51 }
 0x52e   : > { %v1543_v43 = vsel %vm582_vm6, %v1537_v9, %v1539_v23  ;;  %v1542_v27 = vsel %vm582_vm6, %v1539_v23, %v1541_v24  ;;  %v1544_v49 = vsel %vm582_vm6, %v1541_v24, %v1537_v9 }
 0x52f   : > { %v1546_v5 = vmul.f32 %v1545_v42, %v1543_v43  ;;  %v1547_v36 = vmul.f32 %v1545_v42, %v1542_v27  ;;  %v1548_v30 = vmul.f32 %v1545_v42, %v1544_v49 }
 0x531   : > { %v1553_v47 = vpop.permute.xlu1 %1552  ;;  %v1555_v28 = vpop.permute.xlu0 %1554  ;;  %v1549_v40 = vadd.f32 %v1546_v5, %v1533_v38  ;;  %v1550_v33 = vadd.f32 %v1547_v36, %v1534_v59  ;;  %v1551_v9 = vadd.f32 %v1548_v30, %v1535_v35  ;;  %v2148_v5 = vld [vmem:[%s2281_s28 + $0x18] sm:$0xff]  ;;  %v2151_v30 = vld [vmem:[%s2281_s28 + $0x10] sm:$0xff] }
 0x532   : > { %v1559_v1 = vsel %vm607_vm7, %v1553_v47, %v1555_v28 }
 0x533   : > { %v1562_v31 = vmul.f32 %v1561_v0, %v1559_v1 }
 0x535   : > { %v1557_v39 = vpop.permute.xlu1 %1556  ;;  %v1569_v53 = vpop.permute.xlu0 %1568  ;;  %v1565_v61 = vadd.f32 %v1562_v31, %v1549_v40 }
 0x536   : > { %v1558_v12 = vsel %vm607_vm7, %v1555_v28, %v1557_v39  ;;  %v1560_v54 = vsel %vm607_vm7, %v1557_v39, %v1553_v47  ;;  %v2152_v39 = vld [vmem:[%s2281_s28 + $0x28] sm:$0xff] }
 0x537   : > { %v1563_v29 = vmul.f32 %v1561_v0, %v1558_v12  ;;  %v1564_v62 = vmul.f32 %v1561_v0, %v1560_v54 }
 0x539   : > { %v1571_v10 = vpop.permute.xlu1 %1570  ;;  %v1573_v11 = vpop.permute.xlu0 %1572  ;;  %v1566_v63 = vadd.f32 %v1563_v29, %v1550_v33  ;;  %v1567_v17 = vadd.f32 %v1564_v62, %v1551_v9 }
 0x53a   : > { %v1575_v14 = vsel %vm632_vm8, %v1569_v53, %v1571_v10  ;;  %v1574_v15 = vsel %vm632_vm8, %v1571_v10, %v1573_v11  ;;  %v1576_v52 = vsel %vm632_vm8, %v1573_v11, %v1569_v53 }
 0x53b   : > { %v1578_v20 = vmul.f32 %v1577_v8, %v1575_v14  ;;  %v1579_v4 = vmul.f32 %v1577_v8, %v1574_v15  ;;  %v1580_v21 = vmul.f32 %v1577_v8, %v1576_v52 }
 0x53d   : > { %v1581_v22 = vadd.f32 %v1578_v20, %v1565_v61  ;;  %v1582_v23 = vadd.f32 %v1579_v4, %v1566_v63  ;;  %v1583_v24 = vadd.f32 %v1580_v21, %v1567_v17 }
 0x53f   : > { %v1584_v26 = vsub.f32 0.0, %v1581_v22  ;;  %v1585_v13 = vsub.f32 0.0, %v1582_v23  ;;  %v1586_v19 = vsub.f32 0.0, %v1583_v24 }
 0x541   : > { %v1587_v25 = vmul.f32 1.442695, %v1584_v26  ;;  %v1589_v32 = vmul.f32 1.442695, %v1585_v13  ;;  %v1591_v6 = vmul.f32 1.442695, %v1586_v19 }
 0x543   : > { %2135 = vpow2.f32 %v1587_v25 }
 0x544   : > { %2137 = vpow2.f32 %v1589_v32 }
 0x545   : > { %2139 = vpow2.f32 %v1591_v6 }
 0x54d   : > { %v2136_v7 = vpop.eup %2135 }
 0x54e   : > { %v2138_v37 = vpop.eup %2137  ;;  %v1593_v18 = vadd.f32 1.0, %v2136_v7 }
 0x54f   : > { %v2140_v41 = vpop.eup %2139  ;;  %v1594_v42 = vadd.f32 1.0, %v2138_v37 }
 0x550   : > { %2141 = vrcp.f32 %v1593_v18  ;;  %v1595_v43 = vadd.f32 1.0, %v2140_v41 }
 0x551   : > { %2143 = vrcp.f32 %v1594_v42 }
 0x552   : > { %2145 = vrcp.f32 %v1595_v43 }
 0x55a   : > { %v2142_v45 = vpop.eup %2141 }
 0x55b   : > { %v2144_v46 = vpop.eup %2143  ;;  %v1602_v44 = vrot.slane %v2142_v45, %v2488_v57 }
 0x55c   : > { %v2146_v27 = vpop.eup %2145  ;;  %v1606_v47 = vrot.slane %v2144_v46, %v2488_v57 }
 0x55d   : > { %v1611_v28 = vmul.f32 %v1602_v44, %v2765_v58  ;;  %v1614_v48 = vmul.f32 %v1602_v44, %v2758_v55  ;;  %v1610_v49 = vrot.slane %v2146_v27, %v2488_v57  ;;  %v2149_v57 = vld [vmem:[%s2281_s28 + $0x8] sm:$0xff]  ;;  %v2150_v58 = vld [vmem:[%s2281_s28 + $0x20] sm:$0xff] }
 0x55e   : > { %v1612_v0 = vmul.f32 %v1606_v47, %v2768_v16  ;;  %v1615_v1 = vmul.f32 %v1606_v47, %v2760_v56 }
 0x55f   : > { %v1617_v50 = vadd.f32 %v2147_v2, %v1611_v28  ;;  %v1620_v34 = vadd.f32 %v2148_v5, %v1614_v48  ;;  %v1613_v36 = vmul.f32 %v1610_v49, %v2771_v3  ;;  %v1616_v38 = vmul.f32 %v1610_v49, %v2762_v60 }
 0x560   : > { %v1618_v55 = vadd.f32 %v2149_v57, %v1612_v0  ;;  %v1621_v16 = vadd.f32 %v2150_v58, %v1615_v1 }
 0x561   : > { %v1623_v51 = vmax.f32 %v1617_v50, 0.0  ;;  %v1626_v56 = vmax.f32 %v1620_v34, 0.0  ;;  %v1619_v31 = vadd.f32 %v2151_v30, %v1613_v36  ;;  %v1622_v53 = vadd.f32 %v2152_v39, %v1616_v38 }
 0x562   : > { %v1624_v59 = vmax.f32 %v1618_v55, 0.0  ;;  %v1627_v12 = vmax.f32 %v1621_v16, 0.0 }
 0x563   : > { %1629 = vst [vmem:[%s400_s26] sm:$0xff] %v1623_v51  ;;  %1632 = vst [vmem:[%s400_s26 + $0x18] sm:$0xff] %v1626_v56  ;;  %v1625_v60 = vmax.f32 %v1619_v31, 0.0  ;;  %v1628_v3 = vmax.f32 %v1622_v53, 0.0 }
 0x564   : > { %1630 = vst [vmem:[%s400_s26 + $0x8] sm:$0xff] %v1624_v59  ;;  %1633 = vst [vmem:[%s400_s26 + $0x20] sm:$0xff] %v1627_v12 }
 0x565   : > { %1631 = vst [vmem:[%s400_s26 + $0x10] sm:$0xff] %v1625_v60  ;;  %1634 = vst [vmem:[%s400_s26 + $0x28] sm:$0xff] %v1628_v3 }
 0x566 PF: > { %s22_s17 = sadd.s32 1, %s2178_s17  }
 0x567   : > { %p19_p1 = scmp.ge.s32.totalorder %s22_s17, 4  }
 0x569   :  { %21 = sbr.rel (!%p19_p1) target bundleno = 1 (0x1), region = 99 }
 0x570   :  { %1656 = vsyncpa [#allocation4], 1 }
 0x571   :  { %1658 = vsyncpa [#allocation4 + $0x1], 1 }

</bundles_post_ra>
